<compile_context>
chip_gen: v7x
topology: tpu7x:2x2x1
jax: 0.10.0
libtpu: 0.0.40
codegen_flags: <defaults>
</compile_context>

<pallas_src>
import jax
import jax.numpy as jnp
from jax.experimental import pallas as pl
from jax.experimental.pallas import tpu as pltpu


def autoencoder_kernel(x_ref,                       # (T*B, D_in) bf16, time-major flat
                       wi1_ref, wh1_ref, b1_ref,    # encoder LSTM   (D_in -> H)
                       wi2_ref, wh2_ref, b2_ref,    # bottleneck LSTM (H -> Z)
                       wi3_ref, b3_ref,             # decoder LSTM   (Z -> H), zero-state
                       wo_ref, bo_ref,              # output Linear  (H -> D_in)
                       out_ref, z_ref):
    TB, _ = x_ref.shape
    B = out_ref.shape[0]
    T = TB // B
    H = wh1_ref.shape[0]
    Z = z_ref.shape[1]
    f32, bf16 = jnp.float32, jnp.bfloat16

    # ---- hoisted: layer-1 input projection for ALL timesteps, one bf16 matmul,
    # kept in vregs (no VMEM scratch round trip) ----
    g1 = (jnp.dot(x_ref[...], wi1_ref[...], preferred_element_type=f32)
          + b1_ref[...])                                  # (T*B, 4H) f32

    # ---- hoisted loads / broadcasts (not re-emitted per iteration) ----
    wh1 = wh1_ref[...]                                    # (H, 4H)  bf16
    wi2 = wi2_ref[...]                                    # (H, 4Z)  bf16
    wh2 = wh2_ref[...]                                    # (Z, 4Z)  bf16
    b2 = jnp.broadcast_to(b2_ref[...], (B, 4 * Z))        # broadcast once, f32

    def gates_to_hc(gates, c, hid):
        # Reordered gate layout [i | f | o | g]:
        #   one sigmoid push over the first 3*hid lanes, one tanh over the last hid.
        sfo = jax.nn.sigmoid(gates[:, :3 * hid])
        g = jnp.tanh(gates[:, 3 * hid:])
        i = sfo[:, :hid]
        f = sfo[:, hid:2 * hid]
        o = sfo[:, 2 * hid:3 * hid]
        c_new = f * c + i * g
        return o * jnp.tanh(c_new), c_new

    h1 = jnp.zeros((B, H), f32)
    c1 = jnp.zeros((B, H), f32)
    h2 = jnp.zeros((B, Z), f32)
    c2 = jnp.zeros((B, Z), f32)

    # T is small/static -> fully unrolled; g1 slice starts are compile-time
    # constants (tile-aligned since B is a multiple of 8).
    for t in range(T):
        # Bottleneck recurrent matmul depends only on step t-1 state: issue it
        # first so it overlaps the layer-1 matmul / EUP work of this step.
        rec2 = jnp.dot(h2.astype(bf16), wh2, preferred_element_type=f32)
        # Encoder LSTM: only the recurrent matmul remains on the serial path.
        gates1 = g1[t * B:(t + 1) * B, :] + jnp.dot(
            h1.astype(bf16), wh1, preferred_element_type=f32)
        h1, c1 = gates_to_hc(gates1, c1, H)
        # Bottleneck LSTM.
        gates2 = jnp.dot(h1.astype(bf16), wi2, preferred_element_type=f32) + rec2 + b2
        h2, c2 = gates_to_hc(gates2, c2, Z)

    z = h2                                   # bottleneck h_n[0]  (= z in PyTorch)
    z_ref[...] = z

    # Decoder: one LSTM step on z with zero initial (h, c), specialized:
    #   gates = z @ Wi3 + b3 ; c = i*g ; h = o*tanh(c)   (h0 @ Wh3 and f*c0 are 0)
    gd = (jnp.dot(z.astype(bf16), wi3_ref[...], preferred_element_type=f32)
          + b3_ref[...])
    sfo = jax.nn.sigmoid(gd[:, :3 * H])      # one push; the f part is unused
    g_d = jnp.tanh(gd[:, 3 * H:])
    i_d = sfo[:, :H]
    o_d = sfo[:, 2 * H:3 * H]
    h_d = o_d * jnp.tanh(i_d * g_d)
    out_ref[...] = (jnp.dot(h_d.astype(bf16), wo_ref[...], preferred_element_type=f32)
                    + bo_ref[...])
    # TODO(synk): low priority -- pack out/z into one lane-padded output buffer
    # to save one output DMA per call if this kernel is ever invoked in a loop.


def _reorder_ifgo_to_ifog(w, hid, axis=-1):
    """Permute gate blocks from PyTorch order [i,f,g,o] to [i,f,o,g]."""
    i, f, g, o = jnp.split(w, 4, axis=axis)
    return jnp.concatenate([i, f, o, g], axis=axis)


def autoencoder_forward(x, params):
    """x: (T, B, D_in) float32. Returns (flat_recon, z) like forward(return_z=True)."""
    T, B, D = x.shape
    H = params["wh1"].shape[0]
    Z = params["wh2"].shape[0]

    # Pad batch to a full 8-sublane tile (padded rows are independent in an LSTM
    # with zero init state; sliced off below).
    B_pad = max(8, -(-B // 8) * 8)
    if B_pad != B:
        x = jnp.pad(x, ((0, 0), (0, B_pad - B), (0, 0)))

    bf16 = jnp.bfloat16
    ro = _reorder_ifgo_to_ifog
    # Gate reordering + bf16 casts are trace-time wrapper work (free per call
    # under jit once constants fold / weights are reused).
    wi1 = ro(params["wi1"], H).astype(bf16)
    wh1 = ro(params["wh1"], H).astype(bf16)
    b1 = ro(params["b1"], H)
    wi2 = ro(params["wi2"], Z).astype(bf16)
    wh2 = ro(params["wh2"], Z).astype(bf16)
    b2 = ro(params["b2"], Z)
    wi3 = ro(params["wi3"], H).astype(bf16)
    b3 = ro(params["b3"], H)
    wo = params["wo"].astype(bf16)
    bo = params["bo"]

    x2d = x.reshape(T * B_pad, D).astype(bf16)   # free in XLA; avoids in-kernel reshape

    args = (x2d, wi1, wh1, b1, wi2, wh2, b2, wi3, b3, wo, bo)

    vmem = pl.BlockSpec(memory_space=pltpu.MemorySpace.VMEM)
    out, z = pl.pallas_call(
        autoencoder_kernel,
        out_shape=(jax.ShapeDtypeStruct((B_pad, D), jnp.float32),
                   jax.ShapeDtypeStruct((B_pad, Z), jnp.float32)),
        in_specs=[vmem] * len(args),
        out_specs=(vmem, vmem),
    )(*args)
    # torch.flatten on the (1, B, D) decoder output -> 1-D of length B*D.
    return out[:B].reshape(-1), z[:B]


def init_params(key, input_dim, hidden_dim, z_dim):
    """Deterministic synthetic init mirroring PyTorch LSTM/Linear shapes.
    Weights stored pre-transposed as (in, out), PyTorch gate order [i,f,g,o];
    each LSTM's two biases (b_ih + b_hh) folded into a single bias per layer."""
    def uni(k, shape, bound):
        return jax.random.uniform(k, shape, jnp.float32, -bound, bound)

    ks = jax.random.split(key, 12)
    kh = 1.0 / jnp.sqrt(hidden_dim)
    kz = 1.0 / jnp.sqrt(z_dim)
    kd = 1.0 / jnp.sqrt(hidden_dim)
    return {
        # encoder LSTM(input_dim -> hidden_dim)
        "wi1": uni(ks[0], (input_dim, 4 * hidden_dim), kh),
        "wh1": uni(ks[1], (hidden_dim, 4 * hidden_dim), kh),
        "b1":  uni(ks[2], (1, 4 * hidden_dim), kh),
        # bottleneck LSTM(hidden_dim -> z_dim)
        "wi2": uni(ks[3], (hidden_dim, 4 * z_dim), kz),
        "wh2": uni(ks[4], (z_dim, 4 * z_dim), kz),
        "b2":  uni(ks[5], (1, 4 * z_dim), kz),
        # decoder LSTM(z_dim -> hidden_dim)
        "wi3": uni(ks[6], (z_dim, 4 * hidden_dim), kh),
        "wh3": uni(ks[7], (hidden_dim, 4 * hidden_dim), kh),  # unused: zero-state decoder
        "b3":  uni(ks[8], (1, 4 * hidden_dim), kh),
        # output Linear(hidden_dim -> input_dim)
        "wo":  uni(ks[9], (hidden_dim, input_dim), kd),
        "bo":  uni(ks[10], (1, input_dim), kd),
    }


def _reference_forward(x, params):
    """Pure-JAX reference of the PyTorch module (unfused, f32 HIGHEST precision)."""
    T, B, D = x.shape
    H = params["wh1"].shape[0]
    Z = params["wh2"].shape[0]
    hp = jax.lax.Precision.HIGHEST

    def cell(x_t, h, c, wi, wh, b, hid):
        gates = (jnp.dot(x_t, wi, precision=hp)
                 + jnp.dot(h, wh, precision=hp) + b)
        i = jax.nn.sigmoid(gates[:, :hid])
        f = jax.nn.sigmoid(gates[:, hid:2 * hid])
        g = jnp.tanh(gates[:, 2 * hid:3 * hid])
        o = jax.nn.sigmoid(gates[:, 3 * hid:4 * hid])
        c = f * c + i * g
        return o * jnp.tanh(c), c

    h1 = jnp.zeros((B, H)); c1 = jnp.zeros((B, H))
    h2 = jnp.zeros((B, Z)); c2 = jnp.zeros((B, Z))
    for t in range(T):
        h1, c1 = cell(x[t], h1, c1, params["wi1"], params["wh1"], params["b1"], H)
        h2, c2 = cell(h1, h2, c2, params["wi2"], params["wh2"], params["b2"], Z)
    z = h2
    hd, _ = cell(z, jnp.zeros((B, H)), jnp.zeros((B, H)),
                 params["wi3"], params["wh3"], params["b3"], H)
    out = jnp.dot(hd, params["wo"], precision=hp) + params["bo"]
    return out.reshape(-1), z


if __name__ == "__main__":
    seq_len, batch, input_dim, hidden_dim, z_dim = 8, 2, 16, 32, 8

    key = jax.random.PRNGKey(0)
    kx, kp = jax.random.split(key)
    x = jax.random.normal(kx, (seq_len, batch, input_dim), dtype=jnp.float32)
    params = init_params(kp, input_dim, hidden_dim, z_dim)

    recon, z = jax.jit(autoencoder_forward)(x, params)
    jax.block_until_ready((recon, z))

    assert recon.shape == (batch * input_dim,)
    assert z.shape == (batch, z_dim)

    # Sanity-check the fused/reordered bf16-MXU kernel against plain JAX math.
    ref_recon, ref_z = _reference_forward(x, params)
    assert jnp.allclose(recon, ref_recon, atol=5e-2, rtol=5e-2)
    assert jnp.allclose(z, ref_z, atol=5e-2, rtol=5e-2)

    print("KERNEL_OK")
</pallas_src>

<mosaic_0001>
module attributes {stable_mosaic.version = 11 : i64} {
  func.func @autoencoder_kernel(%arg0: memref<64x16xbf16, #tpu.memory_space<vmem>>, %arg1: memref<16x128xbf16, #tpu.memory_space<vmem>>, %arg2: memref<32x128xbf16, #tpu.memory_space<vmem>>, %arg3: memref<1x128xf32, #tpu.memory_space<vmem>>, %arg4: memref<32x32xbf16, #tpu.memory_space<vmem>>, %arg5: memref<8x32xbf16, #tpu.memory_space<vmem>>, %arg6: memref<1x32xf32, #tpu.memory_space<vmem>>, %arg7: memref<8x128xbf16, #tpu.memory_space<vmem>>, %arg8: memref<1x128xf32, #tpu.memory_space<vmem>>, %arg9: memref<32x16xbf16, #tpu.memory_space<vmem>>, %arg10: memref<1x16xf32, #tpu.memory_space<vmem>>, %arg11: memref<8x16xf32, #tpu.memory_space<vmem>>, %arg12: memref<8x8xf32, #tpu.memory_space<vmem>>) attributes {dimension_semantics = [], scalar_prefetch = 0 : i64, scratch_operands = 0 : i64, tpu.core_type = #tpu.core_type<tc>} {
    %c0 = arith.constant 0 : index
    %c0_0 = arith.constant 0 : index
    %0 = vector.load %arg0[%c0, %c0_0] : memref<64x16xbf16, #tpu.memory_space<vmem>>, vector<64x16xbf16>
    %c0_1 = arith.constant 0 : index
    %c0_2 = arith.constant 0 : index
    %1 = vector.load %arg1[%c0_1, %c0_2] : memref<16x128xbf16, #tpu.memory_space<vmem>>, vector<16x128xbf16>
    %cst = arith.constant dense<0.000000e+00> : vector<64x128xf32>
    %2 = tpu.matmul %0, %1, %cst {dimension_numbers = #tpu.dot_dimension_numbers<[1], [0], [0], [1], [0, 0, 1, 1], [], []>} : vector<64x16xbf16>, vector<16x128xbf16>, vector<64x128xf32> -> vector<64x128xf32>
    %c0_3 = arith.constant 0 : index
    %c0_4 = arith.constant 0 : index
    %3 = vector.load %arg3[%c0_3, %c0_4] : memref<1x128xf32, #tpu.memory_space<vmem>>, vector<1x128xf32>
    %4 = vector.broadcast %3 : vector<1x128xf32> to vector<64x128xf32>
    %5 = arith.addf %2, %4 : vector<64x128xf32>
    %c0_5 = arith.constant 0 : index
    %c0_6 = arith.constant 0 : index
    %6 = vector.load %arg2[%c0_5, %c0_6] : memref<32x128xbf16, #tpu.memory_space<vmem>>, vector<32x128xbf16>
    %c0_7 = arith.constant 0 : index
    %c0_8 = arith.constant 0 : index
    %7 = vector.load %arg4[%c0_7, %c0_8] : memref<32x32xbf16, #tpu.memory_space<vmem>>, vector<32x32xbf16>
    %c0_9 = arith.constant 0 : index
    %c0_10 = arith.constant 0 : index
    %8 = vector.load %arg5[%c0_9, %c0_10] : memref<8x32xbf16, #tpu.memory_space<vmem>>, vector<8x32xbf16>
    %c0_11 = arith.constant 0 : index
    %c0_12 = arith.constant 0 : index
    %9 = vector.load %arg6[%c0_11, %c0_12] : memref<1x32xf32, #tpu.memory_space<vmem>>, vector<1x32xf32>
    %10 = vector.shape_cast %9 : vector<1x32xf32> to vector<1x32xf32>
    %11 = vector.broadcast %10 : vector<1x32xf32> to vector<8x32xf32>
    %cst_13 = arith.constant 0.000000e+00 : f32
    %12 = vector.broadcast %cst_13 : f32 to vector<8x32xf32>
    %cst_14 = arith.constant 0.000000e+00 : f32
    %13 = vector.broadcast %cst_14 : f32 to vector<8x32xf32>
    %cst_15 = arith.constant 0.000000e+00 : f32
    %14 = vector.broadcast %cst_15 : f32 to vector<8x8xf32>
    %cst_16 = arith.constant 0.000000e+00 : f32
    %15 = vector.broadcast %cst_16 : f32 to vector<8x8xf32>
    %16 = arith.truncf %14 : vector<8x8xf32> to vector<8x8xbf16>
    %cst_17 = arith.constant dense<0.000000e+00> : vector<8x32xf32>
    %17 = tpu.matmul %16, %8, %cst_17 {dimension_numbers = #tpu.dot_dimension_numbers<[1], [0], [0], [1], [0, 0, 1, 1], [], []>} : vector<8x8xbf16>, vector<8x32xbf16>, vector<8x32xf32> -> vector<8x32xf32>
    %18 = vector.extract_strided_slice %5 {offsets = [0, 0], sizes = [8, 128], strides = [1, 1]} : vector<64x128xf32> to vector<8x128xf32>
    %19 = arith.truncf %12 : vector<8x32xf32> to vector<8x32xbf16>
    %cst_18 = arith.constant dense<0.000000e+00> : vector<8x128xf32>
    %20 = tpu.matmul %19, %6, %cst_18 {dimension_numbers = #tpu.dot_dimension_numbers<[1], [0], [0], [1], [0, 0, 1, 1], [], []>} : vector<8x32xbf16>, vector<32x128xbf16>, vector<8x128xf32> -> vector<8x128xf32>
    %21 = arith.addf %18, %20 : vector<8x128xf32>
    %22 = vector.extract_strided_slice %21 {offsets = [0, 0], sizes = [8, 96], strides = [1, 1]} : vector<8x128xf32> to vector<8x96xf32>
    %23 = arith.negf %22 : vector<8x96xf32>
    %24 = math.exp %23 : vector<8x96xf32>
    %cst_19 = arith.constant 1.000000e+00 : f32
    %25 = vector.broadcast %cst_19 : f32 to vector<8x96xf32>
    %26 = arith.addf %25, %24 : vector<8x96xf32>
    %27 = arith.divf %25, %26 : vector<8x96xf32>
    %28 = vector.extract_strided_slice %21 {offsets = [0, 96], sizes = [8, 32], strides = [1, 1]} : vector<8x128xf32> to vector<8x32xf32>
    %29 = math.tanh %28 : vector<8x32xf32>
    %30 = vector.extract_strided_slice %27 {offsets = [0, 0], sizes = [8, 32], strides = [1, 1]} : vector<8x96xf32> to vector<8x32xf32>
    %31 = vector.extract_strided_slice %27 {offsets = [0, 32], sizes = [8, 32], strides = [1, 1]} : vector<8x96xf32> to vector<8x32xf32>
    %32 = vector.extract_strided_slice %27 {offsets = [0, 64], sizes = [8, 32], strides = [1, 1]} : vector<8x96xf32> to vector<8x32xf32>
    %33 = arith.mulf %31, %13 : vector<8x32xf32>
    %34 = arith.mulf %30, %29 : vector<8x32xf32>
    %35 = arith.addf %33, %34 : vector<8x32xf32>
    %36 = math.tanh %35 : vector<8x32xf32>
    %37 = arith.mulf %32, %36 : vector<8x32xf32>
    %38 = arith.truncf %37 : vector<8x32xf32> to vector<8x32xbf16>
    %cst_20 = arith.constant dense<0.000000e+00> : vector<8x32xf32>
    %39 = tpu.matmul %38, %7, %cst_20 {dimension_numbers = #tpu.dot_dimension_numbers<[1], [0], [0], [1], [0, 0, 1, 1], [], []>} : vector<8x32xbf16>, vector<32x32xbf16>, vector<8x32xf32> -> vector<8x32xf32>
    %40 = arith.addf %39, %17 : vector<8x32xf32>
    %41 = arith.addf %40, %11 : vector<8x32xf32>
    %42 = vector.extract_strided_slice %41 {offsets = [0, 0], sizes = [8, 24], strides = [1, 1]} : vector<8x32xf32> to vector<8x24xf32>
    %43 = arith.negf %42 : vector<8x24xf32>
    %44 = math.exp %43 : vector<8x24xf32>
    %cst_21 = arith.constant 1.000000e+00 : f32
    %45 = vector.broadcast %cst_21 : f32 to vector<8x24xf32>
    %46 = arith.addf %45, %44 : vector<8x24xf32>
    %47 = arith.divf %45, %46 : vector<8x24xf32>
    %48 = vector.extract_strided_slice %41 {offsets = [0, 24], sizes = [8, 8], strides = [1, 1]} : vector<8x32xf32> to vector<8x8xf32>
    %49 = math.tanh %48 : vector<8x8xf32>
    %50 = vector.extract_strided_slice %47 {offsets = [0, 0], sizes = [8, 8], strides = [1, 1]} : vector<8x24xf32> to vector<8x8xf32>
    %51 = vector.extract_strided_slice %47 {offsets = [0, 8], sizes = [8, 8], strides = [1, 1]} : vector<8x24xf32> to vector<8x8xf32>
    %52 = vector.extract_strided_slice %47 {offsets = [0, 16], sizes = [8, 8], strides = [1, 1]} : vector<8x24xf32> to vector<8x8xf32>
    %53 = arith.mulf %51, %15 : vector<8x8xf32>
    %54 = arith.mulf %50, %49 : vector<8x8xf32>
    %55 = arith.addf %53, %54 : vector<8x8xf32>
    %56 = math.tanh %55 : vector<8x8xf32>
    %57 = arith.mulf %52, %56 : vector<8x8xf32>
    %58 = arith.truncf %57 : vector<8x8xf32> to vector<8x8xbf16>
    %cst_22 = arith.constant dense<0.000000e+00> : vector<8x32xf32>
    %59 = tpu.matmul %58, %8, %cst_22 {dimension_numbers = #tpu.dot_dimension_numbers<[1], [0], [0], [1], [0, 0, 1, 1], [], []>} : vector<8x8xbf16>, vector<8x32xbf16>, vector<8x32xf32> -> vector<8x32xf32>
    %60 = vector.extract_strided_slice %5 {offsets = [8, 0], sizes = [8, 128], strides = [1, 1]} : vector<64x128xf32> to vector<8x128xf32>
    %61 = arith.truncf %37 : vector<8x32xf32> to vector<8x32xbf16>
    %cst_23 = arith.constant dense<0.000000e+00> : vector<8x128xf32>
    %62 = tpu.matmul %61, %6, %cst_23 {dimension_numbers = #tpu.dot_dimension_numbers<[1], [0], [0], [1], [0, 0, 1, 1], [], []>} : vector<8x32xbf16>, vector<32x128xbf16>, vector<8x128xf32> -> vector<8x128xf32>
    %63 = arith.addf %60, %62 : vector<8x128xf32>
    %64 = vector.extract_strided_slice %63 {offsets = [0, 0], sizes = [8, 96], strides = [1, 1]} : vector<8x128xf32> to vector<8x96xf32>
    %65 = arith.negf %64 : vector<8x96xf32>
    %66 = math.exp %65 : vector<8x96xf32>
    %cst_24 = arith.constant 1.000000e+00 : f32
    %67 = vector.broadcast %cst_24 : f32 to vector<8x96xf32>
    %68 = arith.addf %67, %66 : vector<8x96xf32>
    %69 = arith.divf %67, %68 : vector<8x96xf32>
    %70 = vector.extract_strided_slice %63 {offsets = [0, 96], sizes = [8, 32], strides = [1, 1]} : vector<8x128xf32> to vector<8x32xf32>
    %71 = math.tanh %70 : vector<8x32xf32>
    %72 = vector.extract_strided_slice %69 {offsets = [0, 0], sizes = [8, 32], strides = [1, 1]} : vector<8x96xf32> to vector<8x32xf32>
    %73 = vector.extract_strided_slice %69 {offsets = [0, 32], sizes = [8, 32], strides = [1, 1]} : vector<8x96xf32> to vector<8x32xf32>
    %74 = vector.extract_strided_slice %69 {offsets = [0, 64], sizes = [8, 32], strides = [1, 1]} : vector<8x96xf32> to vector<8x32xf32>
    %75 = arith.mulf %73, %35 : vector<8x32xf32>
    %76 = arith.mulf %72, %71 : vector<8x32xf32>
    %77 = arith.addf %75, %76 : vector<8x32xf32>
    %78 = math.tanh %77 : vector<8x32xf32>
    %79 = arith.mulf %74, %78 : vector<8x32xf32>
    %80 = arith.truncf %79 : vector<8x32xf32> to vector<8x32xbf16>
    %cst_25 = arith.constant dense<0.000000e+00> : vector<8x32xf32>
    %81 = tpu.matmul %80, %7, %cst_25 {dimension_numbers = #tpu.dot_dimension_numbers<[1], [0], [0], [1], [0, 0, 1, 1], [], []>} : vector<8x32xbf16>, vector<32x32xbf16>, vector<8x32xf32> -> vector<8x32xf32>
    %82 = arith.addf %81, %59 : vector<8x32xf32>
    %83 = arith.addf %82, %11 : vector<8x32xf32>
    %84 = vector.extract_strided_slice %83 {offsets = [0, 0], sizes = [8, 24], strides = [1, 1]} : vector<8x32xf32> to vector<8x24xf32>
    %85 = arith.negf %84 : vector<8x24xf32>
    %86 = math.exp %85 : vector<8x24xf32>
    %cst_26 = arith.constant 1.000000e+00 : f32
    %87 = vector.broadcast %cst_26 : f32 to vector<8x24xf32>
    %88 = arith.addf %87, %86 : vector<8x24xf32>
    %89 = arith.divf %87, %88 : vector<8x24xf32>
    %90 = vector.extract_strided_slice %83 {offsets = [0, 24], sizes = [8, 8], strides = [1, 1]} : vector<8x32xf32> to vector<8x8xf32>
    %91 = math.tanh %90 : vector<8x8xf32>
    %92 = vector.extract_strided_slice %89 {offsets = [0, 0], sizes = [8, 8], strides = [1, 1]} : vector<8x24xf32> to vector<8x8xf32>
    %93 = vector.extract_strided_slice %89 {offsets = [0, 8], sizes = [8, 8], strides = [1, 1]} : vector<8x24xf32> to vector<8x8xf32>
    %94 = vector.extract_strided_slice %89 {offsets = [0, 16], sizes = [8, 8], strides = [1, 1]} : vector<8x24xf32> to vector<8x8xf32>
    %95 = arith.mulf %93, %55 : vector<8x8xf32>
    %96 = arith.mulf %92, %91 : vector<8x8xf32>
    %97 = arith.addf %95, %96 : vector<8x8xf32>
    %98 = math.tanh %97 : vector<8x8xf32>
    %99 = arith.mulf %94, %98 : vector<8x8xf32>
    %100 = arith.truncf %99 : vector<8x8xf32> to vector<8x8xbf16>
    %cst_27 = arith.constant dense<0.000000e+00> : vector<8x32xf32>
    %101 = tpu.matmul %100, %8, %cst_27 {dimension_numbers = #tpu.dot_dimension_numbers<[1], [0], [0], [1], [0, 0, 1, 1], [], []>} : vector<8x8xbf16>, vector<8x32xbf16>, vector<8x32xf32> -> vector<8x32xf32>
    %102 = vector.extract_strided_slice %5 {offsets = [16, 0], sizes = [8, 128], strides = [1, 1]} : vector<64x128xf32> to vector<8x128xf32>
    %103 = arith.truncf %79 : vector<8x32xf32> to vector<8x32xbf16>
    %cst_28 = arith.constant dense<0.000000e+00> : vector<8x128xf32>
    %104 = tpu.matmul %103, %6, %cst_28 {dimension_numbers = #tpu.dot_dimension_numbers<[1], [0], [0], [1], [0, 0, 1, 1], [], []>} : vector<8x32xbf16>, vector<32x128xbf16>, vector<8x128xf32> -> vector<8x128xf32>
    %105 = arith.addf %102, %104 : vector<8x128xf32>
    %106 = vector.extract_strided_slice %105 {offsets = [0, 0], sizes = [8, 96], strides = [1, 1]} : vector<8x128xf32> to vector<8x96xf32>
    %107 = arith.negf %106 : vector<8x96xf32>
    %108 = math.exp %107 : vector<8x96xf32>
    %cst_29 = arith.constant 1.000000e+00 : f32
    %109 = vector.broadcast %cst_29 : f32 to vector<8x96xf32>
    %110 = arith.addf %109, %108 : vector<8x96xf32>
    %111 = arith.divf %109, %110 : vector<8x96xf32>
    %112 = vector.extract_strided_slice %105 {offsets = [0, 96], sizes = [8, 32], strides = [1, 1]} : vector<8x128xf32> to vector<8x32xf32>
    %113 = math.tanh %112 : vector<8x32xf32>
    %114 = vector.extract_strided_slice %111 {offsets = [0, 0], sizes = [8, 32], strides = [1, 1]} : vector<8x96xf32> to vector<8x32xf32>
    %115 = vector.extract_strided_slice %111 {offsets = [0, 32], sizes = [8, 32], strides = [1, 1]} : vector<8x96xf32> to vector<8x32xf32>
    %116 = vector.extract_strided_slice %111 {offsets = [0, 64], sizes = [8, 32], strides = [1, 1]} : vector<8x96xf32> to vector<8x32xf32>
    %117 = arith.mulf %115, %77 : vector<8x32xf32>
    %118 = arith.mulf %114, %113 : vector<8x32xf32>
    %119 = arith.addf %117, %118 : vector<8x32xf32>
    %120 = math.tanh %119 : vector<8x32xf32>
    %121 = arith.mulf %116, %120 : vector<8x32xf32>
    %122 = arith.truncf %121 : vector<8x32xf32> to vector<8x32xbf16>
    %cst_30 = arith.constant dense<0.000000e+00> : vector<8x32xf32>
    %123 = tpu.matmul %122, %7, %cst_30 {dimension_numbers = #tpu.dot_dimension_numbers<[1], [0], [0], [1], [0, 0, 1, 1], [], []>} : vector<8x32xbf16>, vector<32x32xbf16>, vector<8x32xf32> -> vector<8x32xf32>
    %124 = arith.addf %123, %101 : vector<8x32xf32>
    %125 = arith.addf %124, %11 : vector<8x32xf32>
    %126 = vector.extract_strided_slice %125 {offsets = [0, 0], sizes = [8, 24], strides = [1, 1]} : vector<8x32xf32> to vector<8x24xf32>
    %127 = arith.negf %126 : vector<8x24xf32>
    %128 = math.exp %127 : vector<8x24xf32>
    %cst_31 = arith.constant 1.000000e+00 : f32
    %129 = vector.broadcast %cst_31 : f32 to vector<8x24xf32>
    %130 = arith.addf %129, %128 : vector<8x24xf32>
    %131 = arith.divf %129, %130 : vector<8x24xf32>
    %132 = vector.extract_strided_slice %125 {offsets = [0, 24], sizes = [8, 8], strides = [1, 1]} : vector<8x32xf32> to vector<8x8xf32>
    %133 = math.tanh %132 : vector<8x8xf32>
    %134 = vector.extract_strided_slice %131 {offsets = [0, 0], sizes = [8, 8], strides = [1, 1]} : vector<8x24xf32> to vector<8x8xf32>
    %135 = vector.extract_strided_slice %131 {offsets = [0, 8], sizes = [8, 8], strides = [1, 1]} : vector<8x24xf32> to vector<8x8xf32>
    %136 = vector.extract_strided_slice %131 {offsets = [0, 16], sizes = [8, 8], strides = [1, 1]} : vector<8x24xf32> to vector<8x8xf32>
    %137 = arith.mulf %135, %97 : vector<8x8xf32>
    %138 = arith.mulf %134, %133 : vector<8x8xf32>
    %139 = arith.addf %137, %138 : vector<8x8xf32>
    %140 = math.tanh %139 : vector<8x8xf32>
    %141 = arith.mulf %136, %140 : vector<8x8xf32>
    %142 = arith.truncf %141 : vector<8x8xf32> to vector<8x8xbf16>
    %cst_32 = arith.constant dense<0.000000e+00> : vector<8x32xf32>
    %143 = tpu.matmul %142, %8, %cst_32 {dimension_numbers = #tpu.dot_dimension_numbers<[1], [0], [0], [1], [0, 0, 1, 1], [], []>} : vector<8x8xbf16>, vector<8x32xbf16>, vector<8x32xf32> -> vector<8x32xf32>
    %144 = vector.extract_strided_slice %5 {offsets = [24, 0], sizes = [8, 128], strides = [1, 1]} : vector<64x128xf32> to vector<8x128xf32>
    %145 = arith.truncf %121 : vector<8x32xf32> to vector<8x32xbf16>
    %cst_33 = arith.constant dense<0.000000e+00> : vector<8x128xf32>
    %146 = tpu.matmul %145, %6, %cst_33 {dimension_numbers = #tpu.dot_dimension_numbers<[1], [0], [0], [1], [0, 0, 1, 1], [], []>} : vector<8x32xbf16>, vector<32x128xbf16>, vector<8x128xf32> -> vector<8x128xf32>
    %147 = arith.addf %144, %146 : vector<8x128xf32>
    %148 = vector.extract_strided_slice %147 {offsets = [0, 0], sizes = [8, 96], strides = [1, 1]} : vector<8x128xf32> to vector<8x96xf32>
    %149 = arith.negf %148 : vector<8x96xf32>
    %150 = math.exp %149 : vector<8x96xf32>
    %cst_34 = arith.constant 1.000000e+00 : f32
    %151 = vector.broadcast %cst_34 : f32 to vector<8x96xf32>
    %152 = arith.addf %151, %150 : vector<8x96xf32>
    %153 = arith.divf %151, %152 : vector<8x96xf32>
    %154 = vector.extract_strided_slice %147 {offsets = [0, 96], sizes = [8, 32], strides = [1, 1]} : vector<8x128xf32> to vector<8x32xf32>
    %155 = math.tanh %154 : vector<8x32xf32>
    %156 = vector.extract_strided_slice %153 {offsets = [0, 0], sizes = [8, 32], strides = [1, 1]} : vector<8x96xf32> to vector<8x32xf32>
    %157 = vector.extract_strided_slice %153 {offsets = [0, 32], sizes = [8, 32], strides = [1, 1]} : vector<8x96xf32> to vector<8x32xf32>
    %158 = vector.extract_strided_slice %153 {offsets = [0, 64], sizes = [8, 32], strides = [1, 1]} : vector<8x96xf32> to vector<8x32xf32>
    %159 = arith.mulf %157, %119 : vector<8x32xf32>
    %160 = arith.mulf %156, %155 : vector<8x32xf32>
    %161 = arith.addf %159, %160 : vector<8x32xf32>
    %162 = math.tanh %161 : vector<8x32xf32>
    %163 = arith.mulf %158, %162 : vector<8x32xf32>
    %164 = arith.truncf %163 : vector<8x32xf32> to vector<8x32xbf16>
    %cst_35 = arith.constant dense<0.000000e+00> : vector<8x32xf32>
    %165 = tpu.matmul %164, %7, %cst_35 {dimension_numbers = #tpu.dot_dimension_numbers<[1], [0], [0], [1], [0, 0, 1, 1], [], []>} : vector<8x32xbf16>, vector<32x32xbf16>, vector<8x32xf32> -> vector<8x32xf32>
    %166 = arith.addf %165, %143 : vector<8x32xf32>
    %167 = arith.addf %166, %11 : vector<8x32xf32>
    %168 = vector.extract_strided_slice %167 {offsets = [0, 0], sizes = [8, 24], strides = [1, 1]} : vector<8x32xf32> to vector<8x24xf32>
    %169 = arith.negf %168 : vector<8x24xf32>
    %170 = math.exp %169 : vector<8x24xf32>
    %cst_36 = arith.constant 1.000000e+00 : f32
    %171 = vector.broadcast %cst_36 : f32 to vector<8x24xf32>
    %172 = arith.addf %171, %170 : vector<8x24xf32>
    %173 = arith.divf %171, %172 : vector<8x24xf32>
    %174 = vector.extract_strided_slice %167 {offsets = [0, 24], sizes = [8, 8], strides = [1, 1]} : vector<8x32xf32> to vector<8x8xf32>
    %175 = math.tanh %174 : vector<8x8xf32>
    %176 = vector.extract_strided_slice %173 {offsets = [0, 0], sizes = [8, 8], strides = [1, 1]} : vector<8x24xf32> to vector<8x8xf32>
    %177 = vector.extract_strided_slice %173 {offsets = [0, 8], sizes = [8, 8], strides = [1, 1]} : vector<8x24xf32> to vector<8x8xf32>
    %178 = vector.extract_strided_slice %173 {offsets = [0, 16], sizes = [8, 8], strides = [1, 1]} : vector<8x24xf32> to vector<8x8xf32>
    %179 = arith.mulf %177, %139 : vector<8x8xf32>
    %180 = arith.mulf %176, %175 : vector<8x8xf32>
    %181 = arith.addf %179, %180 : vector<8x8xf32>
    %182 = math.tanh %181 : vector<8x8xf32>
    %183 = arith.mulf %178, %182 : vector<8x8xf32>
    %184 = arith.truncf %183 : vector<8x8xf32> to vector<8x8xbf16>
    %cst_37 = arith.constant dense<0.000000e+00> : vector<8x32xf32>
    %185 = tpu.matmul %184, %8, %cst_37 {dimension_numbers = #tpu.dot_dimension_numbers<[1], [0], [0], [1], [0, 0, 1, 1], [], []>} : vector<8x8xbf16>, vector<8x32xbf16>, vector<8x32xf32> -> vector<8x32xf32>
    %186 = vector.extract_strided_slice %5 {offsets = [32, 0], sizes = [8, 128], strides = [1, 1]} : vector<64x128xf32> to vector<8x128xf32>
    %187 = arith.truncf %163 : vector<8x32xf32> to vector<8x32xbf16>
    %cst_38 = arith.constant dense<0.000000e+00> : vector<8x128xf32>
    %188 = tpu.matmul %187, %6, %cst_38 {dimension_numbers = #tpu.dot_dimension_numbers<[1], [0], [0], [1], [0, 0, 1, 1], [], []>} : vector<8x32xbf16>, vector<32x128xbf16>, vector<8x128xf32> -> vector<8x128xf32>
    %189 = arith.addf %186, %188 : vector<8x128xf32>
    %190 = vector.extract_strided_slice %189 {offsets = [0, 0], sizes = [8, 96], strides = [1, 1]} : vector<8x128xf32> to vector<8x96xf32>
    %191 = arith.negf %190 : vector<8x96xf32>
    %192 = math.exp %191 : vector<8x96xf32>
    %cst_39 = arith.constant 1.000000e+00 : f32
    %193 = vector.broadcast %cst_39 : f32 to vector<8x96xf32>
    %194 = arith.addf %193, %192 : vector<8x96xf32>
    %195 = arith.divf %193, %194 : vector<8x96xf32>
    %196 = vector.extract_strided_slice %189 {offsets = [0, 96], sizes = [8, 32], strides = [1, 1]} : vector<8x128xf32> to vector<8x32xf32>
    %197 = math.tanh %196 : vector<8x32xf32>
    %198 = vector.extract_strided_slice %195 {offsets = [0, 0], sizes = [8, 32], strides = [1, 1]} : vector<8x96xf32> to vector<8x32xf32>
    %199 = vector.extract_strided_slice %195 {offsets = [0, 32], sizes = [8, 32], strides = [1, 1]} : vector<8x96xf32> to vector<8x32xf32>
    %200 = vector.extract_strided_slice %195 {offsets = [0, 64], sizes = [8, 32], strides = [1, 1]} : vector<8x96xf32> to vector<8x32xf32>
    %201 = arith.mulf %199, %161 : vector<8x32xf32>
    %202 = arith.mulf %198, %197 : vector<8x32xf32>
    %203 = arith.addf %201, %202 : vector<8x32xf32>
    %204 = math.tanh %203 : vector<8x32xf32>
    %205 = arith.mulf %200, %204 : vector<8x32xf32>
    %206 = arith.truncf %205 : vector<8x32xf32> to vector<8x32xbf16>
    %cst_40 = arith.constant dense<0.000000e+00> : vector<8x32xf32>
    %207 = tpu.matmul %206, %7, %cst_40 {dimension_numbers = #tpu.dot_dimension_numbers<[1], [0], [0], [1], [0, 0, 1, 1], [], []>} : vector<8x32xbf16>, vector<32x32xbf16>, vector<8x32xf32> -> vector<8x32xf32>
    %208 = arith.addf %207, %185 : vector<8x32xf32>
    %209 = arith.addf %208, %11 : vector<8x32xf32>
    %210 = vector.extract_strided_slice %209 {offsets = [0, 0], sizes = [8, 24], strides = [1, 1]} : vector<8x32xf32> to vector<8x24xf32>
    %211 = arith.negf %210 : vector<8x24xf32>
    %212 = math.exp %211 : vector<8x24xf32>
    %cst_41 = arith.constant 1.000000e+00 : f32
    %213 = vector.broadcast %cst_41 : f32 to vector<8x24xf32>
    %214 = arith.addf %213, %212 : vector<8x24xf32>
    %215 = arith.divf %213, %214 : vector<8x24xf32>
    %216 = vector.extract_strided_slice %209 {offsets = [0, 24], sizes = [8, 8], strides = [1, 1]} : vector<8x32xf32> to vector<8x8xf32>
    %217 = math.tanh %216 : vector<8x8xf32>
    %218 = vector.extract_strided_slice %215 {offsets = [0, 0], sizes = [8, 8], strides = [1, 1]} : vector<8x24xf32> to vector<8x8xf32>
    %219 = vector.extract_strided_slice %215 {offsets = [0, 8], sizes = [8, 8], strides = [1, 1]} : vector<8x24xf32> to vector<8x8xf32>
    %220 = vector.extract_strided_slice %215 {offsets = [0, 16], sizes = [8, 8], strides = [1, 1]} : vector<8x24xf32> to vector<8x8xf32>
    %221 = arith.mulf %219, %181 : vector<8x8xf32>
    %222 = arith.mulf %218, %217 : vector<8x8xf32>
    %223 = arith.addf %221, %222 : vector<8x8xf32>
    %224 = math.tanh %223 : vector<8x8xf32>
    %225 = arith.mulf %220, %224 : vector<8x8xf32>
    %226 = arith.truncf %225 : vector<8x8xf32> to vector<8x8xbf16>
    %cst_42 = arith.constant dense<0.000000e+00> : vector<8x32xf32>
    %227 = tpu.matmul %226, %8, %cst_42 {dimension_numbers = #tpu.dot_dimension_numbers<[1], [0], [0], [1], [0, 0, 1, 1], [], []>} : vector<8x8xbf16>, vector<8x32xbf16>, vector<8x32xf32> -> vector<8x32xf32>
    %228 = vector.extract_strided_slice %5 {offsets = [40, 0], sizes = [8, 128], strides = [1, 1]} : vector<64x128xf32> to vector<8x128xf32>
    %229 = arith.truncf %205 : vector<8x32xf32> to vector<8x32xbf16>
    %cst_43 = arith.constant dense<0.000000e+00> : vector<8x128xf32>
    %230 = tpu.matmul %229, %6, %cst_43 {dimension_numbers = #tpu.dot_dimension_numbers<[1], [0], [0], [1], [0, 0, 1, 1], [], []>} : vector<8x32xbf16>, vector<32x128xbf16>, vector<8x128xf32> -> vector<8x128xf32>
    %231 = arith.addf %228, %230 : vector<8x128xf32>
    %232 = vector.extract_strided_slice %231 {offsets = [0, 0], sizes = [8, 96], strides = [1, 1]} : vector<8x128xf32> to vector<8x96xf32>
    %233 = arith.negf %232 : vector<8x96xf32>
    %234 = math.exp %233 : vector<8x96xf32>
    %cst_44 = arith.constant 1.000000e+00 : f32
    %235 = vector.broadcast %cst_44 : f32 to vector<8x96xf32>
    %236 = arith.addf %235, %234 : vector<8x96xf32>
    %237 = arith.divf %235, %236 : vector<8x96xf32>
    %238 = vector.extract_strided_slice %231 {offsets = [0, 96], sizes = [8, 32], strides = [1, 1]} : vector<8x128xf32> to vector<8x32xf32>
    %239 = math.tanh %238 : vector<8x32xf32>
    %240 = vector.extract_strided_slice %237 {offsets = [0, 0], sizes = [8, 32], strides = [1, 1]} : vector<8x96xf32> to vector<8x32xf32>
    %241 = vector.extract_strided_slice %237 {offsets = [0, 32], sizes = [8, 32], strides = [1, 1]} : vector<8x96xf32> to vector<8x32xf32>
    %242 = vector.extract_strided_slice %237 {offsets = [0, 64], sizes = [8, 32], strides = [1, 1]} : vector<8x96xf32> to vector<8x32xf32>
    %243 = arith.mulf %241, %203 : vector<8x32xf32>
    %244 = arith.mulf %240, %239 : vector<8x32xf32>
    %245 = arith.addf %243, %244 : vector<8x32xf32>
    %246 = math.tanh %245 : vector<8x32xf32>
    %247 = arith.mulf %242, %246 : vector<8x32xf32>
    %248 = arith.truncf %247 : vector<8x32xf32> to vector<8x32xbf16>
    %cst_45 = arith.constant dense<0.000000e+00> : vector<8x32xf32>
    %249 = tpu.matmul %248, %7, %cst_45 {dimension_numbers = #tpu.dot_dimension_numbers<[1], [0], [0], [1], [0, 0, 1, 1], [], []>} : vector<8x32xbf16>, vector<32x32xbf16>, vector<8x32xf32> -> vector<8x32xf32>
    %250 = arith.addf %249, %227 : vector<8x32xf32>
    %251 = arith.addf %250, %11 : vector<8x32xf32>
    %252 = vector.extract_strided_slice %251 {offsets = [0, 0], sizes = [8, 24], strides = [1, 1]} : vector<8x32xf32> to vector<8x24xf32>
    %253 = arith.negf %252 : vector<8x24xf32>
    %254 = math.exp %253 : vector<8x24xf32>
    %cst_46 = arith.constant 1.000000e+00 : f32
    %255 = vector.broadcast %cst_46 : f32 to vector<8x24xf32>
    %256 = arith.addf %255, %254 : vector<8x24xf32>
    %257 = arith.divf %255, %256 : vector<8x24xf32>
    %258 = vector.extract_strided_slice %251 {offsets = [0, 24], sizes = [8, 8], strides = [1, 1]} : vector<8x32xf32> to vector<8x8xf32>
    %259 = math.tanh %258 : vector<8x8xf32>
    %260 = vector.extract_strided_slice %257 {offsets = [0, 0], sizes = [8, 8], strides = [1, 1]} : vector<8x24xf32> to vector<8x8xf32>
    %261 = vector.extract_strided_slice %257 {offsets = [0, 8], sizes = [8, 8], strides = [1, 1]} : vector<8x24xf32> to vector<8x8xf32>
    %262 = vector.extract_strided_slice %257 {offsets = [0, 16], sizes = [8, 8], strides = [1, 1]} : vector<8x24xf32> to vector<8x8xf32>
    %263 = arith.mulf %261, %223 : vector<8x8xf32>
    %264 = arith.mulf %260, %259 : vector<8x8xf32>
    %265 = arith.addf %263, %264 : vector<8x8xf32>
    %266 = math.tanh %265 : vector<8x8xf32>
    %267 = arith.mulf %262, %266 : vector<8x8xf32>
    %268 = arith.truncf %267 : vector<8x8xf32> to vector<8x8xbf16>
    %cst_47 = arith.constant dense<0.000000e+00> : vector<8x32xf32>
    %269 = tpu.matmul %268, %8, %cst_47 {dimension_numbers = #tpu.dot_dimension_numbers<[1], [0], [0], [1], [0, 0, 1, 1], [], []>} : vector<8x8xbf16>, vector<8x32xbf16>, vector<8x32xf32> -> vector<8x32xf32>
    %270 = vector.extract_strided_slice %5 {offsets = [48, 0], sizes = [8, 128], strides = [1, 1]} : vector<64x128xf32> to vector<8x128xf32>
    %271 = arith.truncf %247 : vector<8x32xf32> to vector<8x32xbf16>
    %cst_48 = arith.constant dense<0.000000e+00> : vector<8x128xf32>
    %272 = tpu.matmul %271, %6, %cst_48 {dimension_numbers = #tpu.dot_dimension_numbers<[1], [0], [0], [1], [0, 0, 1, 1], [], []>} : vector<8x32xbf16>, vector<32x128xbf16>, vector<8x128xf32> -> vector<8x128xf32>
    %273 = arith.addf %270, %272 : vector<8x128xf32>
    %274 = vector.extract_strided_slice %273 {offsets = [0, 0], sizes = [8, 96], strides = [1, 1]} : vector<8x128xf32> to vector<8x96xf32>
    %275 = arith.negf %274 : vector<8x96xf32>
    %276 = math.exp %275 : vector<8x96xf32>
    %cst_49 = arith.constant 1.000000e+00 : f32
    %277 = vector.broadcast %cst_49 : f32 to vector<8x96xf32>
    %278 = arith.addf %277, %276 : vector<8x96xf32>
    %279 = arith.divf %277, %278 : vector<8x96xf32>
    %280 = vector.extract_strided_slice %273 {offsets = [0, 96], sizes = [8, 32], strides = [1, 1]} : vector<8x128xf32> to vector<8x32xf32>
    %281 = math.tanh %280 : vector<8x32xf32>
    %282 = vector.extract_strided_slice %279 {offsets = [0, 0], sizes = [8, 32], strides = [1, 1]} : vector<8x96xf32> to vector<8x32xf32>
    %283 = vector.extract_strided_slice %279 {offsets = [0, 32], sizes = [8, 32], strides = [1, 1]} : vector<8x96xf32> to vector<8x32xf32>
    %284 = vector.extract_strided_slice %279 {offsets = [0, 64], sizes = [8, 32], strides = [1, 1]} : vector<8x96xf32> to vector<8x32xf32>
    %285 = arith.mulf %283, %245 : vector<8x32xf32>
    %286 = arith.mulf %282, %281 : vector<8x32xf32>
    %287 = arith.addf %285, %286 : vector<8x32xf32>
    %288 = math.tanh %287 : vector<8x32xf32>
    %289 = arith.mulf %284, %288 : vector<8x32xf32>
    %290 = arith.truncf %289 : vector<8x32xf32> to vector<8x32xbf16>
    %cst_50 = arith.constant dense<0.000000e+00> : vector<8x32xf32>
    %291 = tpu.matmul %290, %7, %cst_50 {dimension_numbers = #tpu.dot_dimension_numbers<[1], [0], [0], [1], [0, 0, 1, 1], [], []>} : vector<8x32xbf16>, vector<32x32xbf16>, vector<8x32xf32> -> vector<8x32xf32>
    %292 = arith.addf %291, %269 : vector<8x32xf32>
    %293 = arith.addf %292, %11 : vector<8x32xf32>
    %294 = vector.extract_strided_slice %293 {offsets = [0, 0], sizes = [8, 24], strides = [1, 1]} : vector<8x32xf32> to vector<8x24xf32>
    %295 = arith.negf %294 : vector<8x24xf32>
    %296 = math.exp %295 : vector<8x24xf32>
    %cst_51 = arith.constant 1.000000e+00 : f32
    %297 = vector.broadcast %cst_51 : f32 to vector<8x24xf32>
    %298 = arith.addf %297, %296 : vector<8x24xf32>
    %299 = arith.divf %297, %298 : vector<8x24xf32>
    %300 = vector.extract_strided_slice %293 {offsets = [0, 24], sizes = [8, 8], strides = [1, 1]} : vector<8x32xf32> to vector<8x8xf32>
    %301 = math.tanh %300 : vector<8x8xf32>
    %302 = vector.extract_strided_slice %299 {offsets = [0, 0], sizes = [8, 8], strides = [1, 1]} : vector<8x24xf32> to vector<8x8xf32>
    %303 = vector.extract_strided_slice %299 {offsets = [0, 8], sizes = [8, 8], strides = [1, 1]} : vector<8x24xf32> to vector<8x8xf32>
    %304 = vector.extract_strided_slice %299 {offsets = [0, 16], sizes = [8, 8], strides = [1, 1]} : vector<8x24xf32> to vector<8x8xf32>
    %305 = arith.mulf %303, %265 : vector<8x8xf32>
    %306 = arith.mulf %302, %301 : vector<8x8xf32>
    %307 = arith.addf %305, %306 : vector<8x8xf32>
    %308 = math.tanh %307 : vector<8x8xf32>
    %309 = arith.mulf %304, %308 : vector<8x8xf32>
    %310 = arith.truncf %309 : vector<8x8xf32> to vector<8x8xbf16>
    %cst_52 = arith.constant dense<0.000000e+00> : vector<8x32xf32>
    %311 = tpu.matmul %310, %8, %cst_52 {dimension_numbers = #tpu.dot_dimension_numbers<[1], [0], [0], [1], [0, 0, 1, 1], [], []>} : vector<8x8xbf16>, vector<8x32xbf16>, vector<8x32xf32> -> vector<8x32xf32>
    %312 = vector.extract_strided_slice %5 {offsets = [56, 0], sizes = [8, 128], strides = [1, 1]} : vector<64x128xf32> to vector<8x128xf32>
    %313 = arith.truncf %289 : vector<8x32xf32> to vector<8x32xbf16>
    %cst_53 = arith.constant dense<0.000000e+00> : vector<8x128xf32>
    %314 = tpu.matmul %313, %6, %cst_53 {dimension_numbers = #tpu.dot_dimension_numbers<[1], [0], [0], [1], [0, 0, 1, 1], [], []>} : vector<8x32xbf16>, vector<32x128xbf16>, vector<8x128xf32> -> vector<8x128xf32>
    %315 = arith.addf %312, %314 : vector<8x128xf32>
    %316 = vector.extract_strided_slice %315 {offsets = [0, 0], sizes = [8, 96], strides = [1, 1]} : vector<8x128xf32> to vector<8x96xf32>
    %317 = arith.negf %316 : vector<8x96xf32>
    %318 = math.exp %317 : vector<8x96xf32>
    %cst_54 = arith.constant 1.000000e+00 : f32
    %319 = vector.broadcast %cst_54 : f32 to vector<8x96xf32>
    %320 = arith.addf %319, %318 : vector<8x96xf32>
    %321 = arith.divf %319, %320 : vector<8x96xf32>
    %322 = vector.extract_strided_slice %315 {offsets = [0, 96], sizes = [8, 32], strides = [1, 1]} : vector<8x128xf32> to vector<8x32xf32>
    %323 = math.tanh %322 : vector<8x32xf32>
    %324 = vector.extract_strided_slice %321 {offsets = [0, 0], sizes = [8, 32], strides = [1, 1]} : vector<8x96xf32> to vector<8x32xf32>
    %325 = vector.extract_strided_slice %321 {offsets = [0, 32], sizes = [8, 32], strides = [1, 1]} : vector<8x96xf32> to vector<8x32xf32>
    %326 = vector.extract_strided_slice %321 {offsets = [0, 64], sizes = [8, 32], strides = [1, 1]} : vector<8x96xf32> to vector<8x32xf32>
    %327 = arith.mulf %325, %287 : vector<8x32xf32>
    %328 = arith.mulf %324, %323 : vector<8x32xf32>
    %329 = arith.addf %327, %328 : vector<8x32xf32>
    %330 = math.tanh %329 : vector<8x32xf32>
    %331 = arith.mulf %326, %330 : vector<8x32xf32>
    %332 = arith.truncf %331 : vector<8x32xf32> to vector<8x32xbf16>
    %cst_55 = arith.constant dense<0.000000e+00> : vector<8x32xf32>
    %333 = tpu.matmul %332, %7, %cst_55 {dimension_numbers = #tpu.dot_dimension_numbers<[1], [0], [0], [1], [0, 0, 1, 1], [], []>} : vector<8x32xbf16>, vector<32x32xbf16>, vector<8x32xf32> -> vector<8x32xf32>
    %334 = arith.addf %333, %311 : vector<8x32xf32>
    %335 = arith.addf %334, %11 : vector<8x32xf32>
    %336 = vector.extract_strided_slice %335 {offsets = [0, 0], sizes = [8, 24], strides = [1, 1]} : vector<8x32xf32> to vector<8x24xf32>
    %337 = arith.negf %336 : vector<8x24xf32>
    %338 = math.exp %337 : vector<8x24xf32>
    %cst_56 = arith.constant 1.000000e+00 : f32
    %339 = vector.broadcast %cst_56 : f32 to vector<8x24xf32>
    %340 = arith.addf %339, %338 : vector<8x24xf32>
    %341 = arith.divf %339, %340 : vector<8x24xf32>
    %342 = vector.extract_strided_slice %335 {offsets = [0, 24], sizes = [8, 8], strides = [1, 1]} : vector<8x32xf32> to vector<8x8xf32>
    %343 = math.tanh %342 : vector<8x8xf32>
    %344 = vector.extract_strided_slice %341 {offsets = [0, 0], sizes = [8, 8], strides = [1, 1]} : vector<8x24xf32> to vector<8x8xf32>
    %345 = vector.extract_strided_slice %341 {offsets = [0, 8], sizes = [8, 8], strides = [1, 1]} : vector<8x24xf32> to vector<8x8xf32>
    %346 = vector.extract_strided_slice %341 {offsets = [0, 16], sizes = [8, 8], strides = [1, 1]} : vector<8x24xf32> to vector<8x8xf32>
    %347 = arith.mulf %345, %307 : vector<8x8xf32>
    %348 = arith.mulf %344, %343 : vector<8x8xf32>
    %349 = arith.addf %347, %348 : vector<8x8xf32>
    %350 = math.tanh %349 : vector<8x8xf32>
    %351 = arith.mulf %346, %350 : vector<8x8xf32>
    %c0_57 = arith.constant 0 : index
    %c0_58 = arith.constant 0 : index
    %352 = vector.load %arg12[%c0_57, %c0_58] : memref<8x8xf32, #tpu.memory_space<vmem>>, vector<8x8xf32>
    tpu.vector_store %arg12[%c0_57, %c0_58], %351 {strides = array<i32>} : memref<8x8xf32, #tpu.memory_space<vmem>>, vector<8x8xf32>,
    %353 = arith.truncf %351 : vector<8x8xf32> to vector<8x8xbf16>
    %c0_59 = arith.constant 0 : index
    %c0_60 = arith.constant 0 : index
    %354 = vector.load %arg7[%c0_59, %c0_60] : memref<8x128xbf16, #tpu.memory_space<vmem>>, vector<8x128xbf16>
    %cst_61 = arith.constant dense<0.000000e+00> : vector<8x128xf32>
    %355 = tpu.matmul %353, %354, %cst_61 {dimension_numbers = #tpu.dot_dimension_numbers<[1], [0], [0], [1], [0, 0, 1, 1], [], []>} : vector<8x8xbf16>, vector<8x128xbf16>, vector<8x128xf32> -> vector<8x128xf32>
    %c0_62 = arith.constant 0 : index
    %c0_63 = arith.constant 0 : index
    %356 = vector.load %arg8[%c0_62, %c0_63] : memref<1x128xf32, #tpu.memory_space<vmem>>, vector<1x128xf32>
    %357 = vector.broadcast %356 : vector<1x128xf32> to vector<8x128xf32>
    %358 = arith.addf %355, %357 : vector<8x128xf32>
    %359 = vector.extract_strided_slice %358 {offsets = [0, 0], sizes = [8, 96], strides = [1, 1]} : vector<8x128xf32> to vector<8x96xf32>
    %360 = arith.negf %359 : vector<8x96xf32>
    %361 = math.exp %360 : vector<8x96xf32>
    %cst_64 = arith.constant 1.000000e+00 : f32
    %362 = vector.broadcast %cst_64 : f32 to vector<8x96xf32>
    %363 = arith.addf %362, %361 : vector<8x96xf32>
    %364 = arith.divf %362, %363 : vector<8x96xf32>
    %365 = vector.extract_strided_slice %358 {offsets = [0, 96], sizes = [8, 32], strides = [1, 1]} : vector<8x128xf32> to vector<8x32xf32>
    %366 = math.tanh %365 : vector<8x32xf32>
    %367 = vector.extract_strided_slice %364 {offsets = [0, 0], sizes = [8, 32], strides = [1, 1]} : vector<8x96xf32> to vector<8x32xf32>
    %368 = vector.extract_strided_slice %364 {offsets = [0, 64], sizes = [8, 32], strides = [1, 1]} : vector<8x96xf32> to vector<8x32xf32>
    %369 = arith.mulf %367, %366 : vector<8x32xf32>
    %370 = math.tanh %369 : vector<8x32xf32>
    %371 = arith.mulf %368, %370 : vector<8x32xf32>
    %372 = arith.truncf %371 : vector<8x32xf32> to vector<8x32xbf16>
    %c0_65 = arith.constant 0 : index
    %c0_66 = arith.constant 0 : index
    %373 = vector.load %arg9[%c0_65, %c0_66] : memref<32x16xbf16, #tpu.memory_space<vmem>>, vector<32x16xbf16>
    %cst_67 = arith.constant dense<0.000000e+00> : vector<8x16xf32>
    %374 = tpu.matmul %372, %373, %cst_67 {dimension_numbers = #tpu.dot_dimension_numbers<[1], [0], [0], [1], [0, 0, 1, 1], [], []>} : vector<8x32xbf16>, vector<32x16xbf16>, vector<8x16xf32> -> vector<8x16xf32>
    %c0_68 = arith.constant 0 : index
    %c0_69 = arith.constant 0 : index
    %375 = vector.load %arg10[%c0_68, %c0_69] : memref<1x16xf32, #tpu.memory_space<vmem>>, vector<1x16xf32>
    %376 = vector.broadcast %375 : vector<1x16xf32> to vector<8x16xf32>
    %377 = arith.addf %374, %376 : vector<8x16xf32>
    %c0_70 = arith.constant 0 : index
    %c0_71 = arith.constant 0 : index
    %378 = vector.load %arg11[%c0_70, %c0_71] : memref<8x16xf32, #tpu.memory_space<vmem>>, vector<8x16xf32>
    tpu.vector_store %arg11[%c0_70, %c0_71], %377 {strides = array<i32>} : memref<8x16xf32, #tpu.memory_space<vmem>>, vector<8x16xf32>,
    return
  }
}

</mosaic_0001>

<bundles_post_ra>
// kernel: autoencoder_forward.1
= control target key start
LH: loop header
LB: loop body
LE: loop exit
PB: predicated region body
PF: predicated region fallthrough
CT: control target
= control target key end

     0   :  { %vm182_vm0 = vcmask 1043456   ;;  %v2333_v0 = vmov 0.0   ;;  %vm2334_vm1 = vmmov 0   ;;  %vm84_vm2 = vcmask 130048   ;;  %s2336_s15 = smov 32   ;;  %s2338_s26 = smov 104   ;;  %s2816_s5 = inlined_call_operand.vmem [shape: bf16[8,32], index: 5, kind: input, shape index: {}]   ;;  %s2817_s1 = inlined_call_operand.vmem [shape: bf16[16,128], index: 1, kind: input, shape index: {}]   ;;  %s2818_s2 = inlined_call_operand.vmem [shape: bf16[32,128], index: 2, kind: input, shape index: {}]   ;;  %s2819_s0 = inlined_call_operand.vmem [shape: bf16[64,16], index: 0, kind: input, shape index: {}]   ;;  %s2820_s3 = inlined_call_operand.vmem [shape: f32[1,128], index: 3, kind: input, shape index: {}]   ;;  %s2821_s4 = inlined_call_operand.vmem [shape: bf16[32,32], index: 4, kind: input, shape index: {}]   ;;  %s2822_s6 = inlined_call_operand.vmem [shape: f32[1,32], index: 6, kind: input, shape index: {}]   ;;  %s2823_s7 = inlined_call_operand.vmem [shape: bf16[8,128], index: 7, kind: input, shape index: {}]   ;;  %s2824_s8 = inlined_call_operand.vmem [shape: f32[1,128], index: 8, kind: input, shape index: {}]   ;;  %s2825_s9 = inlined_call_operand.vmem [shape: bf16[32,16], index: 9, kind: input, shape index: {}]   ;;  %s2826_s12 = inlined_call_operand.vmem [shape: f32[8,8], index: 12, kind: output, shape index: {1}]   ;;  %s2827_s10 = inlined_call_operand.vmem [shape: f32[1,16], index: 10, kind: input, shape index: {}]   ;;  %s2828_s11 = inlined_call_operand.vmem [shape: f32[8,16], index: 11, kind: output, shape index: {0}]  }
   0x1   :  { %1982 = vmatprep.subr.bf16.mxu1 %v2333_v0  ;;  %v170_v1 = vld [vmem:[%s2816_s5] sm:$0xf]  ;;  %1984 = vmatprep.mubr.msk.bf16.mxu1 %vm2334_vm1, %v2333_v0  ;;  %v2183_v6 = vld [vmem:[%s2819_s0 + $0x8] sm:$0xff]   ;;  %v2335_v7 = vmov 0   ;;  %v2186_v34 = vld [vmem:[%s2819_s0 + $0x10] sm:$0xff]   ;;  %vm238_vm3 = vcmask 261120  }
   0x2   :  { %v2413_v2 = vsel %vm182_vm0, %v170_v1, 0  ;;  %v2180_v3 = vld [vmem:[%s2817_s1] sm:$0xff]   ;;  %v2436_v8 = vld [vmem:[%s2818_s2 + $0x8] sm:$0xff]   ;;  %v2187_v35 = vld [vmem:[%s2819_s0 + $0x18] sm:$0xff]   ;;  %s2339_s5 = smov 8   ;;  %s2340_s27 = smov 112  }
   0x3   :  { %1983 = vmatpush3.bf16.msra.mxu1 %v2413_v2  ;;  %v2422_v4 = vld [vmem:[%s2818_s2] sm:$0xff]   ;;  %1972 = vmatprep.subr.bf16.mxu0 %v2180_v3  ;;  %v2484_v37 = vld [vmem:[%s2821_s4 + $0x8] sm:$0xff]   ;;  %vm178_vm4 = vcmask 64512  }
   0x4   :  { %1988 = vmatprep.subr.bf16.mxu1 %v2333_v0  ;;  %v2182_v5 = vld [vmem:[%s2819_s0] sm:$0xff]   ;;  %1973 = vmatpush3.bf16.msra.mxu0 %v2180_v3  ;;  %s2337_s0 = smov 64  }
   0x5   :  { %1974 = vmatprep.mubr.msk.bf16.mxu0 %vm84_vm2, %v2182_v5  ;;  %1996 = vmatprep.subr.bf16.mxu0 %v2333_v0  ;;  %v2456_v13 = vld [vmem:[%s2820_s3] ss:$0 sm:$0xff] }
   0x6   :  { %1985 = vmatmul.mubr.bf16.vlgmr.msra.gmra.mrb[0].mxu1 %v2335_v7  ;;  %v2477_v36 = vld [vmem:[%s2821_s4] sm:$0xff]  }
   0x7   :  { %1989 = vmatpush3.bf16.msra.mxu1 %v2422_v4  ;;  %1992 = vmatprep.mubr.msk.bf16.mxu1 %vm2334_vm1, %v2333_v0  ;;  %v2517_v47 = vld [vmem:[%s2822_s6] ss:$0 sm:$0xff] }
   0x8   :  { %1975 = vmatmul.mubr.msk.bf16.vlgmr.msra.gmra.mrb[0].mxu0 %vm84_vm2, %v2183_v6  ;;  %1990 = vmatprep.subr.bf16.mxu1 %v2333_v0 }
   0x9   :  { %1978 = vmatprep.mubr.msk.bf16.mxu0 %vm84_vm2, %v2186_v34  ;;  %1997 = vmatpush3.bf16.msra.mxu0 %v2477_v36 }
   0xa   :  { %1998 = vmatprep.subr.bf16.mxu0 %v2333_v0 }
   0xb   :  { %1991 = vmatpush3.bf16.msra.mxu1 %v2436_v8 }
   0xc   :  { %2004 = vmatprep.subr.bf16.mxu1 %v2333_v0 }
   0xd   :  { %1999 = vmatpush3.bf16.msra.mxu0 %v2484_v37 }
   0xe   :  { %1993 = vmatmul.mubr.bf16.vlgmr.msra.gmra.mrb[4].mxu1 %v2335_v7  ;;  %2010 = vmatprep.subr.bf16.mxu0 %v2333_v0 }
   0xf   :  { %2005 = vmatpush3.bf16.msra.mxu1 %v2413_v2  ;;  %2006 = vmatprep.mubr.msk.bf16.mxu1 %vm2334_vm1, %v2333_v0 }
  0x10   :  { %2018 = vmatprep.subr.bf16.mxu1 %v2333_v0  ;;  %1979 = vmatmul.mubr.msk.bf16.gmra.mrb[4].mxu0 %vm84_vm2, %v2187_v35 }
  0x11   :  { %2000 = vmatprep.mubr.msk.bf16.mxu0 %vm2334_vm1, %v2333_v0 }
  0xd9   :  { %v2449_v9 = vpop.f32.mrb[0].mxu1 }
  0xda   :  { %v1986_v10 = vpop.f32.mrb[1].mxu1 }
  0xdb   :  { %v223_v11 = vpop.f32.mrb[2].mxu1  ;;  %v2451_v12 = vpop.f32.mrb[0].mxu0 }
  0xdc   :  { %v1987_v14 = vpop.f32.mrb[3].mxu1  ;;  %v131_v15 = vpop.f32.mrb[1].mxu0 }
  0xdd   :  { %v2458_v16 = vpop.f32.mrb[2].mxu0  ;;  %v132_v17 = vadd.f32 %v2456_v13, %v131_v15 }
  0xde   :  { %v2461_v18 = vpop.f32.mrb[3].mxu0 }
  0xdf   :  { %v135_v54 = vadd.f32 %v2456_v13, %v2461_v18 }
  0xe1   :  { %v275_v19 = vpop.f32.mrb[4].mxu1 }
  0xe2   :  { %v281_v20 = vadd.f32 %v275_v19, %v132_v17  ;;  %v1994_v21 = vpop.f32.mrb[5].mxu1 }
  0xe3   :  { %v278_v22 = vpop.f32.mrb[6].mxu1  ;;  %v2494_v42 = vpop.f32.mrb[4].mxu0 }
  0xe4   :  { %2191 = vtanh.f32 %v281_v20  ;;  %v1995_v23 = vpop.f32.mrb[7].mxu1  ;;  %v1851_v25 = vmul.f32 -1.442695, %v281_v20  ;;  %v2496_v43 = vpop.f32.mrb[5].mxu0 }
  0xe5   :  { %v2498_v44 = vpop.f32.mrb[6].mxu0 }
  0xe6   :  { %2193 = vpow2.f32 %v1851_v25  ;;  %v2500_v45 = vpop.f32.mrb[7].mxu0 }
  0xee   :  { %v2192_v24 = vpop.eup %2191 }
  0xef   :  { %291 = vrot.lane.b32.xlu0 %v2192_v24, %s2336_s15 }
  0xf0   :  { %v2194_v26 = vpop.eup %2193 }
  0xf1   :  { %v285_v27 = vadd.f32 1.0, %v2194_v26 }
  0xf3   :  { %2195 = vrcp.f32 %v285_v27 }
  0xfd   :  { %v2196_v28 = vpop.eup %2195 }
  0xfe   :  { %v289_v31 = vmul.f32 0.0, %v2196_v28 }
 0x161   :  { %v292_v29 = vpop.permute.xlu0 %291 }
 0x162   :  { %v294_v30 = vmul.f32 %v2196_v28, %v292_v29 }
 0x164   :  { %296 = vrot.lane.b32.xlu0 %v294_v30, %s2336_s15 }
 0x1d6   :  { %v297_v32 = vpop.permute.xlu0 %296 }
 0x1d7   :  { %v2465_v33 = vadd.f32 %v297_v32, %v289_v31 }
 0x1d9   :  { %2197 = vtanh.f32 %v2465_v33 }
 0x1e3   :  { %v2198_v38 = vpop.eup %2197 }
 0x1e4   :  { %302 = vrot.lane.b32.xlu1 %v2198_v38, %s2336_s15 }
 0x256   :  { %v303_v39 = vpop.permute.xlu1 %302 }
 0x257   :  { %v305_v40 = vmul.f32 %v2196_v28, %v303_v39 }
 0x259   :  { %v306_v41 = vpack.c.bf16 %v305_v40, %v305_v40 }
 0x25b   :  { %308 = vrot.lane.b32.xlu1 %v306_v41, %s2337_s0 }
 0x2cd   :  { %v309_v46 = vpop.permute.xlu1 %308 }
 0x2ce   :  { %2001 = vmatmul.mubr.msk.bf16.vlgmr.msra.gmra.mrb[8].mxu0 %vm238_vm3, %v309_v46 }
 0x2cf   :  { %2011 = vmatpush3.bf16.msra.mxu0 %v2422_v4  ;;  %2014 = vmatprep.mubr.msk.bf16.mxu0 %vm2334_vm1, %v2333_v0 }
 0x2d0   :  { %2012 = vmatprep.subr.bf16.mxu0 %v2333_v0 }
 0x2d3   :  { %2013 = vmatpush3.bf16.msra.mxu0 %v2436_v8 }
 0x2d4   :  { %2026 = vmatprep.subr.bf16.mxu0 %v2333_v0 }
 0x2d6   :  { %2015 = vmatmul.mubr.msk.bf16.vlgmr.msra.gmra.mrb[12].mxu0 %vm238_vm3, %v309_v46 }
 0x2d7   :  { %2027 = vmatpush3.bf16.msra.mxu0 %v2413_v2  ;;  %2028 = vmatprep.mubr.msk.bf16.mxu0 %vm2334_vm1, %v2333_v0 }
 0x2d8   :  { %2040 = vmatprep.subr.bf16.mxu0 %v2333_v0 }
 0x3a1   :  { %v359_v48 = vpop.f32.mrb[8].mxu0 }
 0x3a2   :  { %v360_v49 = vadd.f32 %v359_v48, %v2449_v9  ;;  %v2002_v50 = vpop.f32.mrb[9].mxu0 }
 0x3a3   :  { %v362_v51 = vpop.f32.mrb[10].mxu0  ;;  %v140_v50 = vadd.f32 %v2451_v12, %v2456_v13 }
 0x3a4   :  { %v365_v52 = vadd.f32 %v2517_v47, %v360_v49  ;;  %v2003_v53 = vpop.f32.mrb[11].mxu0 }
 0x3a6   :  { %2199 = vtanh.f32 %v365_v52  ;;  %v1855_v62 = vmul.f32 -1.442695, %v365_v52 }
 0x3a9   :  { %v471_v55 = vpop.f32.mrb[12].mxu0 }
 0x3aa   :  { %v477_v56 = vadd.f32 %v471_v55, %v135_v54  ;;  %v2016_v57 = vpop.f32.mrb[13].mxu0 }
 0x3ab   :  { %v474_v58 = vpop.f32.mrb[14].mxu0 }
 0x3ac   :  { %2201 = vtanh.f32 %v477_v56  ;;  %v2017_v59 = vpop.f32.mrb[15].mxu0  ;;  %v1858_v63 = vmul.f32 -1.442695, %v477_v56 }
 0x3ad   :  { %2203 = vpow2.f32 %v1855_v62 }
 0x3ae   :  { %2205 = vpow2.f32 %v1858_v63 }
 0x3b0   :  { %v2200_v60 = vpop.eup %2199 }
 0x3b1   :  { %375 = vrot.lane.b32.xlu0 %v2200_v60, %s2338_s26 }
 0x3b6   :  { %v2202_v61 = vpop.eup %2201 }
 0x3b7   :  { %487 = vrot.lane.b32.xlu1 %v2202_v61, %s2336_s15  ;;  %v2204_v1 = vpop.eup %2203 }
 0x3b8   :  { %v369_v3 = vadd.f32 1.0, %v2204_v1  ;;  %v2206_v5 = vpop.eup %2205 }
 0x3b9   :  { %v481_v6 = vadd.f32 1.0, %v2206_v5 }
 0x3ba   :  { %2207 = vrcp.f32 %v369_v3 }
 0x3bb   :  { %2209 = vrcp.f32 %v481_v6 }
 0x3c4   :  { %v2208_v7 = vpop.eup %2207 }
 0x3c5   :  { %v2210_v11 = vpop.eup %2209  ;;  %v373_v17 = vmul.f32 0.0, %v2208_v7 }
 0x3c6   :  { %v485_v20 = vmul.f32 %v2210_v11, %v2465_v33 }
 0x423   :  { %v376_v9 = vpop.permute.xlu0 %375 }
 0x424   :  { %v378_v10 = vmul.f32 %v2208_v7, %v376_v9 }
 0x426   :  { %380 = vrot.lane.b32.xlu0 %v378_v10, %s2339_s5 }
 0x429   :  { %v488_v14 = vpop.permute.xlu1 %487 }
 0x42a   :  { %v490_v15 = vmul.f32 %v2210_v11, %v488_v14 }
 0x42c   :  { %492 = vrot.lane.b32.xlu1 %v490_v15, %s2336_s15 }
 0x498   :  { %v381_v18 = vpop.permute.xlu0 %380 }
 0x499   :  { %v2527_v19 = vadd.f32 %v381_v18, %v373_v17 }
 0x49b   :  { %2211 = vtanh.f32 %v2527_v19 }
 0x49e   :  { %v493_v21 = vpop.permute.xlu1 %492 }
 0x49f   :  { %v2531_v22 = vadd.f32 %v493_v21, %v485_v20 }
 0x4a1   :  { %2213 = vtanh.f32 %v2531_v22 }
 0x4a5   :  { %v2212_v23 = vpop.eup %2211 }
 0x4a6   :  { %386 = vrot.lane.b32.xlu0 %v2212_v23, %s2339_s5 }
 0x4ab   :  { %v2214_v24 = vpop.eup %2213 }
 0x4ac   :  { %498 = vrot.lane.b32.xlu1 %v2214_v24, %s2336_s15 }
 0x518   :  { %v387_v25 = vpop.permute.xlu0 %386 }
 0x519   :  { %v389_v26 = vmul.f32 %v2208_v7, %v387_v25 }
 0x51b   :  { %v390_v27 = vpack.c.bf16 %v389_v26, %v389_v26 }
 0x51d   :  { %392 = vrot.lane.b32.xlu0 %v390_v27, %s2340_s27 }
 0x51e   :  { %v499_v28 = vpop.permute.xlu1 %498 }
 0x51f   :  { %v501_v29 = vmul.f32 %v2210_v11, %v499_v28 }
 0x521   :  { %v502_v30 = vpack.c.bf16 %v501_v29, %v501_v29 }
 0x523   :  { %504 = vrot.lane.b32.xlu1 %v502_v30, %s2337_s0 }
 0x58f   :  { %v393_v31 = vpop.permute.xlu0 %392 }
 0x590   :  { %2007 = vmatmul.mubr.msk.bf16.vlgmr.msra.gmra.mrb[8].mxu1 %vm178_vm4, %v393_v31 }
 0x591   :  { %2019 = vmatpush3.bf16.msra.mxu1 %v2477_v36  ;;  %2022 = vmatprep.mubr.msk.bf16.mxu1 %vm2334_vm1, %v2333_v0 }
 0x592   :  { %2020 = vmatprep.subr.bf16.mxu1 %v2333_v0 }
 0x595   :  { %2021 = vmatpush3.bf16.msra.mxu1 %v2484_v37  ;;  %v505_v32 = vpop.permute.xlu1 %504 }
 0x596   :  { %2032 = vmatprep.subr.bf16.mxu1 %v2333_v0 }
 0x598   :  { %2023 = vmatmul.mubr.msk.bf16.vlgmr.msra.gmra.mrb[12].mxu1 %vm238_vm3, %v505_v32 }
 0x599   :  { %2033 = vmatpush3.bf16.msra.mxu1 %v2422_v4  ;;  %2036 = vmatprep.mubr.msk.bf16.mxu1 %vm2334_vm1, %v2333_v0 }
 0x59a   :  { %2034 = vmatprep.subr.bf16.mxu1 %v2333_v0 }
 0x59d   :  { %2035 = vmatpush3.bf16.msra.mxu1 %v2436_v8 }
 0x59e   :  { %2048 = vmatprep.subr.bf16.mxu1 %v2333_v0 }
 0x5a0   :  { %2037 = vmatmul.mubr.msk.bf16.vlgmr.msra.gmra.mrb[16].mxu1 %vm238_vm3, %v505_v32 }
 0x5a1   :  { %2049 = vmatpush3.bf16.msra.mxu1 %v2413_v2  ;;  %2050 = vmatprep.mubr.msk.bf16.mxu1 %vm2334_vm1, %v2333_v0 }
 0x5a2   :  { %2062 = vmatprep.subr.bf16.mxu1 %v2333_v0 }
 0x663   :  { %v431_v33 = vpop.f32.mrb[8].mxu1 }
 0x664   :  { %v2008_v34 = vpop.f32.mrb[9].mxu1 }
 0x665   :  { %v434_v35 = vpop.f32.mrb[10].mxu1 }
 0x666   :  { %v2009_v38 = vpop.f32.mrb[11].mxu1 }
 0x66b   :  { %v543_v39 = vpop.f32.mrb[12].mxu1 }
 0x66c   :  { %v544_v40 = vadd.f32 %v543_v39, %v431_v33  ;;  %v2024_v41 = vpop.f32.mrb[13].mxu1 }
 0x66d   :  { %v546_v46 = vpop.f32.mrb[14].mxu1 }
 0x66e   :  { %v549_v48 = vadd.f32 %v2517_v47, %v544_v40  ;;  %v2025_v49 = vpop.f32.mrb[15].mxu1  ;;  %v143_v40 = vadd.f32 %v2458_v16, %v2456_v13 }
 0x670   :  { %2215 = vtanh.f32 %v549_v48  ;;  %v1860_v58 = vmul.f32 -1.442695, %v549_v48 }
 0x673   :  { %v655_v51 = vpop.f32.mrb[16].mxu1 }
 0x674   :  { %v661_v52 = vadd.f32 %v655_v51, %v140_v50  ;;  %v2038_v53 = vpop.f32.mrb[17].mxu1 }
 0x675   :  { %v658_v54 = vpop.f32.mrb[18].mxu1 }
 0x676   :  { %2217 = vtanh.f32 %v661_v52  ;;  %v2039_v55 = vpop.f32.mrb[19].mxu1  ;;  %v1863_v59 = vmul.f32 -1.442695, %v661_v52 }
 0x677   :  { %2219 = vpow2.f32 %v1860_v58 }
 0x678   :  { %2221 = vpow2.f32 %v1863_v59 }
 0x67a   :  { %v2216_v56 = vpop.eup %2215 }
 0x67b   :  { %559 = vrot.lane.b32.xlu0 %v2216_v56, %s2338_s26 }
 0x680   :  { %v2218_v57 = vpop.eup %2217 }
 0x681   :  { %671 = vrot.lane.b32.xlu1 %v2218_v57, %s2336_s15  ;;  %v2220_v60 = vpop.eup %2219 }
 0x682   :  { %v553_v61 = vadd.f32 1.0, %v2220_v60  ;;  %v2222_v62 = vpop.eup %2221 }
 0x683   :  { %v665_v12 = vadd.f32 1.0, %v2222_v62 }
 0x684   :  { %2223 = vrcp.f32 %v553_v61 }
 0x685   :  { %2225 = vrcp.f32 %v665_v12 }
 0x68e   :  { %v2224_v63 = vpop.eup %2223 }
 0x68f   :  { %v2226_v5 = vpop.eup %2225  ;;  %v557_v9 = vmul.f32 %v2224_v63, %v2527_v19 }
 0x690   :  { %v669_v14 = vmul.f32 %v2226_v5, %v2531_v22 }
 0x6ed   :  { %v560_v1 = vpop.permute.xlu0 %559 }
 0x6ee   :  { %v562_v3 = vmul.f32 %v2224_v63, %v560_v1 }
 0x6f0   :  { %564 = vrot.lane.b32.xlu0 %v562_v3, %s2339_s5 }
 0x6f3   :  { %v672_v6 = vpop.permute.xlu1 %671 }
 0x6f4   :  { %v674_v7 = vmul.f32 %v2226_v5, %v672_v6 }
 0x6f6   :  { %676 = vrot.lane.b32.xlu1 %v674_v7, %s2336_s15 }
 0x762   :  { %v565_v10 = vpop.permute.xlu0 %564 }
 0x763   :  { %v2565_v11 = vadd.f32 %v565_v10, %v557_v9 }
 0x765   :  { %2227 = vtanh.f32 %v2565_v11 }
 0x768   :  { %v677_v15 = vpop.permute.xlu1 %676 }
 0x769   :  { %v2569_v17 = vadd.f32 %v677_v15, %v669_v14 }
 0x76b   :  { %2229 = vtanh.f32 %v2569_v17 }
 0x76f   :  { %v2228_v18 = vpop.eup %2227 }
 0x770   :  { %570 = vrot.lane.b32.xlu0 %v2228_v18, %s2339_s5 }
 0x775   :  { %v2230_v20 = vpop.eup %2229 }
 0x776   :  { %682 = vrot.lane.b32.xlu1 %v2230_v20, %s2336_s15 }
 0x7e2   :  { %v571_v21 = vpop.permute.xlu0 %570 }
 0x7e3   :  { %v573_v19 = vmul.f32 %v2224_v63, %v571_v21 }
 0x7e5   :  { %v574_v23 = vpack.c.bf16 %v573_v19, %v573_v19 }
 0x7e7   :  { %576 = vrot.lane.b32.xlu0 %v574_v23, %s2340_s27 }
 0x7e8   :  { %v683_v24 = vpop.permute.xlu1 %682 }
 0x7e9   :  { %v685_v25 = vmul.f32 %v2226_v5, %v683_v24 }
 0x7eb   :  { %v686_v26 = vpack.c.bf16 %v685_v25, %v685_v25 }
 0x7ed   :  { %688 = vrot.lane.b32.xlu1 %v686_v26, %s2337_s0 }
 0x859   :  { %v577_v22 = vpop.permute.xlu0 %576 }
 0x85a   :  { %2029 = vmatmul.mubr.msk.bf16.vlgmr.msra.gmra.mrb[16].mxu0 %vm178_vm4, %v577_v22 }
 0x85b   :  { %2041 = vmatpush3.bf16.msra.mxu0 %v2477_v36  ;;  %2044 = vmatprep.mubr.msk.bf16.mxu0 %vm2334_vm1, %v2333_v0 }
 0x85c   :  { %2042 = vmatprep.subr.bf16.mxu0 %v2333_v0 }
 0x85f   :  { %2043 = vmatpush3.bf16.msra.mxu0 %v2484_v37  ;;  %v689_v27 = vpop.permute.xlu1 %688 }
 0x860   :  { %2054 = vmatprep.subr.bf16.mxu0 %v2333_v0 }
 0x862   :  { %2045 = vmatmul.mubr.msk.bf16.vlgmr.msra.gmra.mrb[20].mxu0 %vm238_vm3, %v689_v27 }
 0x863   :  { %2055 = vmatpush3.bf16.msra.mxu0 %v2422_v4  ;;  %2058 = vmatprep.mubr.msk.bf16.mxu0 %vm2334_vm1, %v2333_v0 }
 0x864   :  { %2056 = vmatprep.subr.bf16.mxu0 %v2333_v0 }
 0x867   :  { %2057 = vmatpush3.bf16.msra.mxu0 %v2436_v8 }
 0x868   :  { %2070 = vmatprep.subr.bf16.mxu0 %v2333_v0 }
 0x86a   :  { %2059 = vmatmul.mubr.msk.bf16.vlgmr.msra.gmra.mrb[24].mxu0 %vm238_vm3, %v689_v27 }
 0x86b   :  { %2071 = vmatpush3.bf16.msra.mxu0 %v2413_v2  ;;  %2072 = vmatprep.mubr.msk.bf16.mxu0 %vm2334_vm1, %v2333_v0 }
 0x86c   :  { %2084 = vmatprep.subr.bf16.mxu0 %v2333_v0 }
 0x92d   :  { %v615_v28 = vpop.f32.mrb[16].mxu0 }
 0x92e   :  { %v2030_v29 = vpop.f32.mrb[17].mxu0 }
 0x92f   :  { %v618_v30 = vpop.f32.mrb[18].mxu0 }
 0x930   :  { %v2031_v31 = vpop.f32.mrb[19].mxu0 }
 0x935   :  { %v727_v32 = vpop.f32.mrb[20].mxu0 }
 0x936   :  { %v728_v33 = vadd.f32 %v727_v32, %v615_v28  ;;  %v2046_v34 = vpop.f32.mrb[21].mxu0  ;;  %v148_v32 = vadd.f32 %v2456_v13, %v2496_v43 }
 0x937   :  { %v730_v35 = vpop.f32.mrb[22].mxu0 }
 0x938   :  { %v733_v38 = vadd.f32 %v2517_v47, %v728_v33  ;;  %v2047_v39 = vpop.f32.mrb[23].mxu0 }
 0x93a   :  { %2231 = vtanh.f32 %v733_v38  ;;  %v1865_v53 = vmul.f32 -1.442695, %v733_v38 }
 0x93d   :  { %v839_v41 = vpop.f32.mrb[24].mxu0 }
 0x93e   :  { %v845_v46 = vadd.f32 %v839_v41, %v143_v40  ;;  %v2060_v48 = vpop.f32.mrb[25].mxu0 }
 0x93f   :  { %v842_v49 = vpop.f32.mrb[26].mxu0 }
 0x940   :  { %2233 = vtanh.f32 %v845_v46  ;;  %v2061_v50 = vpop.f32.mrb[27].mxu0  ;;  %v1868_v54 = vmul.f32 -1.442695, %v845_v46 }
 0x941   :  { %2235 = vpow2.f32 %v1865_v53 }
 0x942   :  { %2237 = vpow2.f32 %v1868_v54 }
 0x944   :  { %v2232_v51 = vpop.eup %2231 }
 0x945   :  { %743 = vrot.lane.b32.xlu0 %v2232_v51, %s2338_s26 }
 0x94a   :  { %v2234_v52 = vpop.eup %2233 }
 0x94b   :  { %855 = vrot.lane.b32.xlu1 %v2234_v52, %s2336_s15  ;;  %v2236_v55 = vpop.eup %2235 }
 0x94c   :  { %v737_v56 = vadd.f32 1.0, %v2236_v55  ;;  %v2238_v57 = vpop.eup %2237 }
 0x94d   :  { %v849_v16 = vadd.f32 1.0, %v2238_v57 }
 0x94e   :  { %2239 = vrcp.f32 %v737_v56 }
 0x94f   :  { %2241 = vrcp.f32 %v849_v16 }
 0x958   :  { %v2240_v58 = vpop.eup %2239 }
 0x959   :  { %v2242_v61 = vpop.eup %2241  ;;  %v741_v63 = vmul.f32 %v2240_v58, %v2565_v11 }
 0x95a   :  { %v853_v5 = vmul.f32 %v2242_v61, %v2569_v17 }
 0x9b7   :  { %v744_v59 = vpop.permute.xlu0 %743 }
 0x9b8   :  { %v746_v60 = vmul.f32 %v2240_v58, %v744_v59 }
 0x9ba   :  { %748 = vrot.lane.b32.xlu0 %v746_v60, %s2339_s5 }
 0x9bd   :  { %v856_v62 = vpop.permute.xlu1 %855 }
 0x9be   :  { %v858_v12 = vmul.f32 %v2242_v61, %v856_v62 }
 0x9c0   :  { %860 = vrot.lane.b32.xlu1 %v858_v12, %s2336_s15 }
 0xa2c   :  { %v749_v1 = vpop.permute.xlu0 %748 }
 0xa2d   :  { %v2603_v3 = vadd.f32 %v749_v1, %v741_v63 }
 0xa2f   :  { %2243 = vtanh.f32 %v2603_v3 }
 0xa32   :  { %v861_v6 = vpop.permute.xlu1 %860 }
 0xa33   :  { %v2607_v7 = vadd.f32 %v861_v6, %v853_v5 }
 0xa35   :  { %2245 = vtanh.f32 %v2607_v7 }
 0xa39   :  { %v2244_v9 = vpop.eup %2243 }
 0xa3a   :  { %754 = vrot.lane.b32.xlu0 %v2244_v9, %s2339_s5 }
 0xa3f   :  { %v2246_v10 = vpop.eup %2245 }
 0xa40   :  { %866 = vrot.lane.b32.xlu1 %v2246_v10, %s2336_s15 }
 0xaac   :  { %v755_v14 = vpop.permute.xlu0 %754 }
 0xaad   :  { %v757_v11 = vmul.f32 %v2240_v58, %v755_v14 }
 0xaaf   :  { %v758_v15 = vpack.c.bf16 %v757_v11, %v757_v11 }
 0xab1   :  { %760 = vrot.lane.b32.xlu0 %v758_v15, %s2340_s27 }
 0xab2   :  { %v867_v18 = vpop.permute.xlu1 %866 }
 0xab3   :  { %v869_v20 = vmul.f32 %v2242_v61, %v867_v18 }
 0xab5   :  { %v870_v21 = vpack.c.bf16 %v869_v20, %v869_v20 }
 0xab7   :  { %872 = vrot.lane.b32.xlu1 %v870_v21, %s2337_s0 }
 0xb23   :  { %v761_v17 = vpop.permute.xlu0 %760 }
 0xb24   :  { %2051 = vmatmul.mubr.msk.bf16.vlgmr.msra.gmra.mrb[20].mxu1 %vm178_vm4, %v761_v17 }
 0xb25   :  { %2063 = vmatpush3.bf16.msra.mxu1 %v2477_v36  ;;  %2066 = vmatprep.mubr.msk.bf16.mxu1 %vm2334_vm1, %v2333_v0 }
 0xb26   :  { %2064 = vmatprep.subr.bf16.mxu1 %v2333_v0 }
 0xb29   :  { %2065 = vmatpush3.bf16.msra.mxu1 %v2484_v37  ;;  %v873_v19 = vpop.permute.xlu1 %872 }
 0xb2a   :  { %2076 = vmatprep.subr.bf16.mxu1 %v2333_v0 }
 0xb2c   :  { %2067 = vmatmul.mubr.msk.bf16.vlgmr.msra.gmra.mrb[24].mxu1 %vm238_vm3, %v873_v19 }
 0xb2d   :  { %2077 = vmatpush3.bf16.msra.mxu1 %v2422_v4  ;;  %2080 = vmatprep.mubr.msk.bf16.mxu1 %vm2334_vm1, %v2333_v0 }
 0xb2e   :  { %2078 = vmatprep.subr.bf16.mxu1 %v2333_v0 }
 0xb31   :  { %2079 = vmatpush3.bf16.msra.mxu1 %v2436_v8 }
 0xb32   :  { %2092 = vmatprep.subr.bf16.mxu1 %v2333_v0 }
 0xb34   :  { %2081 = vmatmul.mubr.msk.bf16.vlgmr.msra.gmra.mrb[28].mxu1 %vm238_vm3, %v873_v19 }
 0xb35   :  { %2093 = vmatpush3.bf16.msra.mxu1 %v2413_v2  ;;  %2094 = vmatprep.mubr.msk.bf16.mxu1 %vm2334_vm1, %v2333_v0 }
 0xb36   :  { %2106 = vmatprep.subr.bf16.mxu1 %v2333_v0 }
 0xbf7   :  { %v799_v23 = vpop.f32.mrb[20].mxu1 }
 0xbf8   :  { %v2052_v24 = vpop.f32.mrb[21].mxu1 }
 0xbf9   :  { %v802_v25 = vpop.f32.mrb[22].mxu1 }
 0xbfa   :  { %v2053_v26 = vpop.f32.mrb[23].mxu1 }
 0xbfb   :  { %v151_v26 = vadd.f32 %v2456_v13, %v2500_v45 }
 0xbff   :  { %v911_v22 = vpop.f32.mrb[24].mxu1 }
 0xc00   :  { %v912_v27 = vadd.f32 %v911_v22, %v799_v23  ;;  %v2068_v28 = vpop.f32.mrb[25].mxu1 }
 0xc01   :  { %v914_v29 = vpop.f32.mrb[26].mxu1 }
 0xc02   :  { %v917_v30 = vadd.f32 %v2517_v47, %v912_v27  ;;  %v2069_v31 = vpop.f32.mrb[27].mxu1 }
 0xc04   :  { %2247 = vtanh.f32 %v917_v30  ;;  %v1870_v46 = vmul.f32 -1.442695, %v917_v30 }
 0xc07   :  { %v1023_v33 = vpop.f32.mrb[28].mxu1 }
 0xc08   :  { %v1029_v34 = vadd.f32 %v1023_v33, %v148_v32  ;;  %v2082_v35 = vpop.f32.mrb[29].mxu1 }
 0xc09   :  { %v1026_v38 = vpop.f32.mrb[30].mxu1 }
 0xc0a   :  { %2249 = vtanh.f32 %v1029_v34  ;;  %v2083_v39 = vpop.f32.mrb[31].mxu1  ;;  %v1873_v48 = vmul.f32 -1.442695, %v1029_v34 }
 0xc0b   :  { %2251 = vpow2.f32 %v1870_v46 }
 0xc0c   :  { %2253 = vpow2.f32 %v1873_v48 }
 0xc0e   :  { %v2248_v40 = vpop.eup %2247 }
 0xc0f   :  { %927 = vrot.lane.b32.xlu0 %v2248_v40, %s2338_s26 }
 0xc14   :  { %v2250_v41 = vpop.eup %2249 }
 0xc15   :  { %1039 = vrot.lane.b32.xlu1 %v2250_v41, %s2336_s15  ;;  %v2252_v49 = vpop.eup %2251 }
 0xc16   :  { %v921_v50 = vadd.f32 1.0, %v2252_v49  ;;  %v2254_v51 = vpop.eup %2253 }
 0xc17   :  { %v1033_v43 = vadd.f32 1.0, %v2254_v51 }
 0xc18   :  { %2255 = vrcp.f32 %v921_v50 }
 0xc19   :  { %2257 = vrcp.f32 %v1033_v43 }
 0xc22   :  { %v2256_v52 = vpop.eup %2255 }
 0xc23   :  { %v2258_v55 = vpop.eup %2257  ;;  %v925_v16 = vmul.f32 %v2256_v52, %v2603_v3 }
 0xc24   :  { %v1037_v60 = vmul.f32 %v2258_v55, %v2607_v7 }
 0xc81   :  { %v928_v53 = vpop.permute.xlu0 %927 }
 0xc82   :  { %v930_v54 = vmul.f32 %v2256_v52, %v928_v53 }
 0xc84   :  { %932 = vrot.lane.b32.xlu0 %v930_v54, %s2339_s5 }
 0xc87   :  { %v1040_v56 = vpop.permute.xlu1 %1039 }
 0xc88   :  { %v1042_v57 = vmul.f32 %v2258_v55, %v1040_v56 }
 0xc8a   :  { %1044 = vrot.lane.b32.xlu1 %v1042_v57, %s2336_s15 }
 0xcf6   :  { %v933_v58 = vpop.permute.xlu0 %932 }
 0xcf7   :  { %v2641_v59 = vadd.f32 %v933_v58, %v925_v16 }
 0xcf9   :  { %2259 = vtanh.f32 %v2641_v59 }
 0xcfc   :  { %v1045_v61 = vpop.permute.xlu1 %1044 }
 0xcfd   :  { %v2645_v62 = vadd.f32 %v1045_v61, %v1037_v60 }
 0xcff   :  { %2261 = vtanh.f32 %v2645_v62 }
 0xd03   :  { %v2260_v12 = vpop.eup %2259 }
 0xd04   :  { %938 = vrot.lane.b32.xlu0 %v2260_v12, %s2339_s5 }
 0xd09   :  { %v2262_v63 = vpop.eup %2261 }
 0xd0a   :  { %1050 = vrot.lane.b32.xlu1 %v2262_v63, %s2336_s15 }
 0xd76   :  { %v939_v1 = vpop.permute.xlu0 %938 }
 0xd77   :  { %v941_v3 = vmul.f32 %v2256_v52, %v939_v1 }
 0xd79   :  { %v942_v5 = vpack.c.bf16 %v941_v3, %v941_v3 }
 0xd7b   :  { %944 = vrot.lane.b32.xlu0 %v942_v5, %s2340_s27 }
 0xd7c   :  { %v1051_v6 = vpop.permute.xlu1 %1050 }
 0xd7d   :  { %v1053_v9 = vmul.f32 %v2258_v55, %v1051_v6 }
 0xd7f   :  { %v1054_v10 = vpack.c.bf16 %v1053_v9, %v1053_v9 }
 0xd81   :  { %1056 = vrot.lane.b32.xlu1 %v1054_v10, %s2337_s0 }
 0xded   :  { %v945_v7 = vpop.permute.xlu0 %944 }
 0xdee   :  { %2073 = vmatmul.mubr.msk.bf16.vlgmr.msra.gmra.mrb[28].mxu0 %vm178_vm4, %v945_v7 }
 0xdef   :  { %2085 = vmatpush3.bf16.msra.mxu0 %v2477_v36  ;;  %2088 = vmatprep.mubr.msk.bf16.mxu0 %vm2334_vm1, %v2333_v0 }
 0xdf0   :  { %2086 = vmatprep.subr.bf16.mxu0 %v2333_v0 }
 0xdf3   :  { %2087 = vmatpush3.bf16.msra.mxu0 %v2484_v37  ;;  %v1057_v14 = vpop.permute.xlu1 %1056 }
 0xdf4   :  { %2098 = vmatprep.subr.bf16.mxu0 %v2333_v0 }
 0xdf6   :  { %2089 = vmatmul.mubr.msk.bf16.vlgmr.msra.gmra.mrb[32].mxu0 %vm238_vm3, %v1057_v14 }
 0xdf7   :  { %2099 = vmatpush3.bf16.msra.mxu0 %v2422_v4  ;;  %2102 = vmatprep.mubr.msk.bf16.mxu0 %vm2334_vm1, %v2333_v0 }
 0xdf8   :  { %2100 = vmatprep.subr.bf16.mxu0 %v2333_v0 }
 0xdfb   :  { %2101 = vmatpush3.bf16.msra.mxu0 %v2436_v8 }
 0xdfc   :  { %2114 = vmatprep.subr.bf16.mxu0 %v2333_v0 }
 0xdfe   :  { %2103 = vmatmul.mubr.msk.bf16.vlgmr.msra.gmra.mrb[36].mxu0 %vm238_vm3, %v1057_v14 }
 0xdff   :  { %2115 = vmatpush3.bf16.msra.mxu0 %v2413_v2  ;;  %2116 = vmatprep.mubr.msk.bf16.mxu0 %vm2334_vm1, %v2333_v0 }
 0xe00   :  { %2128 = vmatprep.subr.bf16.mxu0 %v2333_v0 }
 0xec1   :  { %v983_v11 = vpop.f32.mrb[28].mxu0 }
 0xec2   :  { %v2074_v15 = vpop.f32.mrb[29].mxu0 }
 0xec3   :  { %v986_v18 = vpop.f32.mrb[30].mxu0 }
 0xec4   :  { %v2075_v20 = vpop.f32.mrb[31].mxu0 }
 0xec9   :  { %v1095_v21 = vpop.f32.mrb[32].mxu0 }
 0xeca   :  { %v1096_v17 = vadd.f32 %v1095_v21, %v983_v11  ;;  %v2090_v19 = vpop.f32.mrb[33].mxu0 }
 0xecb   :  { %v1098_v23 = vpop.f32.mrb[34].mxu0 }
 0xecc   :  { %v1101_v24 = vadd.f32 %v2517_v47, %v1096_v17  ;;  %v2091_v25 = vpop.f32.mrb[35].mxu0 }
 0xece   :  { %2263 = vtanh.f32 %v1101_v24  ;;  %v1875_v33 = vmul.f32 -1.442695, %v1101_v24 }
 0xed1   :  { %v1207_v22 = vpop.f32.mrb[36].mxu0 }
 0xed2   :  { %v1213_v27 = vadd.f32 %v1207_v22, %v151_v26  ;;  %v2104_v28 = vpop.f32.mrb[37].mxu0 }
 0xed3   :  { %v1210_v29 = vpop.f32.mrb[38].mxu0 }
 0xed4   :  { %2265 = vtanh.f32 %v1213_v27  ;;  %v2105_v30 = vpop.f32.mrb[39].mxu0  ;;  %v1878_v34 = vmul.f32 -1.442695, %v1213_v27 }
 0xed5   :  { %2267 = vpow2.f32 %v1875_v33 }
 0xed6   :  { %2269 = vpow2.f32 %v1878_v34 }
 0xed8   :  { %v2264_v31 = vpop.eup %2263 }
 0xed9   :  { %1111 = vrot.lane.b32.xlu0 %v2264_v31, %s2338_s26 }
 0xede   :  { %v2266_v32 = vpop.eup %2265 }
 0xedf   :  { %1223 = vrot.lane.b32.xlu1 %v2266_v32, %s2336_s15  ;;  %v2268_v35 = vpop.eup %2267 }
 0xee0   :  { %v1105_v38 = vadd.f32 1.0, %v2268_v35  ;;  %v2270_v39 = vpop.eup %2269 }
 0xee1   :  { %v1217_v45 = vadd.f32 1.0, %v2270_v39 }
 0xee2   :  { %2271 = vrcp.f32 %v1105_v38 }
 0xee3   :  { %2273 = vrcp.f32 %v1217_v45 }
 0xeec   :  { %v2272_v40 = vpop.eup %2271 }
 0xeed   :  { %v2274_v48 = vpop.eup %2273  ;;  %v1109_v51 = vmul.f32 %v2272_v40, %v2641_v59 }
 0xeee   :  { %v1221_v53 = vmul.f32 %v2274_v48, %v2645_v62 }
 0xf4b   :  { %v1112_v41 = vpop.permute.xlu0 %1111 }
 0xf4c   :  { %v1114_v46 = vmul.f32 %v2272_v40, %v1112_v41 }
 0xf4e   :  { %1116 = vrot.lane.b32.xlu0 %v1114_v46, %s2339_s5 }
 0xf51   :  { %v1224_v49 = vpop.permute.xlu1 %1223 }
 0xf52   :  { %v1226_v50 = vmul.f32 %v2274_v48, %v1224_v49 }
 0xf54   :  { %1228 = vrot.lane.b32.xlu1 %v1226_v50, %s2336_s15 }
 0xfc0   :  { %v1117_v43 = vpop.permute.xlu0 %1116 }
 0xfc1   :  { %v2679_v52 = vadd.f32 %v1117_v43, %v1109_v51 }
 0xfc3   :  { %2275 = vtanh.f32 %v2679_v52 }
 0xfc6   :  { %v1229_v54 = vpop.permute.xlu1 %1228 }
 0xfc7   :  { %v2683_v55 = vadd.f32 %v1229_v54, %v1221_v53  ;;  %v2327_v53 = vld [vmem:[%s2818_s2] sm:$0xff]  }
 0xfc9   :  { %2277 = vtanh.f32 %v2683_v55 }
 0xfcd   :  { %v2276_v56 = vpop.eup %2275 }
 0xfce   :  { %1122 = vrot.lane.b32.xlu0 %v2276_v56, %s2339_s5 }
 0xfd3   :  { %v2278_v57 = vpop.eup %2277 }
 0xfd4   :  { %1234 = vrot.lane.b32.xlu1 %v2278_v57, %s2336_s15 }
0x1040   :  { %v1123_v16 = vpop.permute.xlu0 %1122 }
0x1041   :  { %v1125_v58 = vmul.f32 %v2272_v40, %v1123_v16 }
0x1043   :  { %v1126_v59 = vpack.c.bf16 %v1125_v58, %v1125_v58 }
0x1045   :  { %1128 = vrot.lane.b32.xlu0 %v1126_v59, %s2340_s27 }
0x1046   :  { %v1235_v60 = vpop.permute.xlu1 %1234 }
0x1047   :  { %v1237_v61 = vmul.f32 %v2274_v48, %v1235_v60 }
0x1049   :  { %v1238_v12 = vpack.c.bf16 %v1237_v61, %v1237_v61 }
0x104b   :  { %1240 = vrot.lane.b32.xlu1 %v1238_v12, %s2337_s0  ;;  %v2329_v12 = vld [vmem:[%s2820_s3] ss:$0 sm:$0xff] }
0x10b7   :  { %v1129_v62 = vpop.permute.xlu0 %1128 }
0x10b8   :  { %2095 = vmatmul.mubr.msk.bf16.vlgmr.msra.gmra.mrb[32].mxu1 %vm178_vm4, %v1129_v62  ;;  %v159_v62 = vadd.f32 %v2329_v12, %v2498_v44 }
0x10b9   :  { %2107 = vmatpush3.bf16.msra.mxu1 %v2477_v36  ;;  %2110 = vmatprep.mubr.msk.bf16.mxu1 %vm2334_vm1, %v2333_v0 }
0x10ba   :  { %2108 = vmatprep.subr.bf16.mxu1 %v2333_v0 }
0x10bd   :  { %2109 = vmatpush3.bf16.msra.mxu1 %v2484_v37  ;;  %v1241_v63 = vpop.permute.xlu1 %1240 }
0x10be   :  { %2120 = vmatprep.subr.bf16.mxu1 %v2333_v0 }
0x10c0   :  { %2111 = vmatmul.mubr.msk.bf16.vlgmr.msra.gmra.mrb[36].mxu1 %vm238_vm3, %v1241_v63 }
0x10c1   :  { %2121 = vmatpush3.bf16.msra.mxu1 %v2422_v4  ;;  %2124 = vmatprep.mubr.msk.bf16.mxu1 %vm2334_vm1, %v2333_v0 }
0x10c2   :  { %2122 = vmatprep.subr.bf16.mxu1 %v2333_v0 }
0x10c5   :  { %2123 = vmatpush3.bf16.msra.mxu1 %v2436_v8 }
0x10c6   :  { %2136 = vmatprep.subr.bf16.mxu1 %v2333_v0 }
0x10c8   :  { %2125 = vmatmul.mubr.msk.bf16.vlgmr.msra.gmra.mrb[40].mxu1 %vm238_vm3, %v1241_v63 }
0x10c9   :  { %2137 = vmatpush3.bf16.msra.mxu1 %v2413_v2  ;;  %2138 = vmatprep.mubr.msk.bf16.mxu1 %vm2334_vm1, %v2333_v0  ;;  %v156_v2 = vadd.f32 %v2494_v42, %v2456_v13 }
0x10ca   :  { %2150 = vmatprep.subr.bf16.mxu1 %v2333_v0 }
0x118b   :  { %v1167_v1 = vpop.f32.mrb[32].mxu1 }
0x118c   :  { %v2096_v4 = vpop.f32.mrb[33].mxu1 }
0x118d   :  { %v1170_v3 = vpop.f32.mrb[34].mxu1 }
0x118e   :  { %v2097_v5 = vpop.f32.mrb[35].mxu1 }
0x1193   :  { %v1279_v6 = vpop.f32.mrb[36].mxu1 }
0x1194   :  { %v1280_v9 = vadd.f32 %v1279_v6, %v1167_v1  ;;  %v2112_v10 = vpop.f32.mrb[37].mxu1 }
0x1195   :  { %v1282_v7 = vpop.f32.mrb[38].mxu1 }
0x1196   :  { %v1285_v8 = vadd.f32 %v2517_v47, %v1280_v9  ;;  %v2113_v14 = vpop.f32.mrb[39].mxu1 }
0x1198   :  { %2279 = vtanh.f32 %v1285_v8  ;;  %v1880_v23 = vmul.f32 -1.442695, %v1285_v8 }
0x119b   :  { %v1391_v11 = vpop.f32.mrb[40].mxu1 }
0x119c   :  { %v1397_v15 = vadd.f32 %v1391_v11, %v156_v2  ;;  %v2126_v18 = vpop.f32.mrb[41].mxu1 }
0x119d   :  { %v1394_v20 = vpop.f32.mrb[42].mxu1 }
0x119e   :  { %2281 = vtanh.f32 %v1397_v15  ;;  %v2127_v21 = vpop.f32.mrb[43].mxu1  ;;  %v1883_v24 = vmul.f32 -1.442695, %v1397_v15 }
0x119f   :  { %2283 = vpow2.f32 %v1880_v23 }
0x11a0   :  { %2285 = vpow2.f32 %v1883_v24 }
0x11a2   :  { %v2280_v17 = vpop.eup %2279 }
0x11a3   :  { %1295 = vrot.lane.b32.xlu0 %v2280_v17, %s2338_s26 }
0x11a8   :  { %v2282_v19 = vpop.eup %2281 }
0x11a9   :  { %1407 = vrot.lane.b32.xlu1 %v2282_v19, %s2336_s15  ;;  %v2284_v25 = vpop.eup %2283 }
0x11aa   :  { %v1289_v26 = vadd.f32 1.0, %v2284_v25  ;;  %v2286_v22 = vpop.eup %2285 }
0x11ab   :  { %v1401_v13 = vadd.f32 1.0, %v2286_v22 }
0x11ac   :  { %2287 = vrcp.f32 %v1289_v26 }
0x11ad   :  { %2289 = vrcp.f32 %v1401_v13 }
0x11b6   :  { %v2288_v42 = vpop.eup %2287 }
0x11b7   :  { %v2290_v29 = vpop.eup %2289  ;;  %v1293_v32 = vmul.f32 %v2288_v42, %v2679_v52 }
0x11b8   :  { %v1405_v35 = vmul.f32 %v2290_v29, %v2683_v55 }
0x1215   :  { %v1296_v27 = vpop.permute.xlu0 %1295 }
0x1216   :  { %v1298_v28 = vmul.f32 %v2288_v42, %v1296_v27 }
0x1218   :  { %1300 = vrot.lane.b32.xlu0 %v1298_v28, %s2339_s5 }
0x121b   :  { %v1408_v30 = vpop.permute.xlu1 %1407 }
0x121c   :  { %v1410_v31 = vmul.f32 %v2290_v29, %v1408_v30 }
0x121e   :  { %1412 = vrot.lane.b32.xlu1 %v1410_v31, %s2336_s15 }
0x128a   :  { %v1301_v33 = vpop.permute.xlu0 %1300 }
0x128b   :  { %v2717_v34 = vadd.f32 %v1301_v33, %v1293_v32  ;;  %v2330_v33 = vld [vmem:[%s2821_s4] sm:$0xff]  }
0x128d   :  { %2291 = vtanh.f32 %v2717_v34 }
0x1290   :  { %v1413_v38 = vpop.permute.xlu1 %1412 }
0x1291   :  { %v2721_v39 = vadd.f32 %v1413_v38, %v1405_v35 }
0x1293   :  { %2293 = vtanh.f32 %v2721_v39 }
0x1297   :  { %v2292_v45 = vpop.eup %2291 }
0x1298   :  { %1306 = vrot.lane.b32.xlu0 %v2292_v45, %s2339_s5 }
0x129d   :  { %v2294_v40 = vpop.eup %2293 }
0x129e   :  { %1418 = vrot.lane.b32.xlu1 %v2294_v40, %s2336_s15 }
0x130a   :  { %v1307_v41 = vpop.permute.xlu0 %1306 }
0x130b   :  { %v1309_v46 = vmul.f32 %v2288_v42, %v1307_v41 }
0x130d   :  { %v1310_v48 = vpack.c.bf16 %v1309_v46, %v1309_v46 }
0x130f   :  { %1312 = vrot.lane.b32.xlu0 %v1310_v48, %s2340_s27 }
0x1310   :  { %v1419_v49 = vpop.permute.xlu1 %1418 }
0x1311   :  { %v1421_v50 = vmul.f32 %v2290_v29, %v1419_v49 }
0x1313   :  { %v1422_v51 = vpack.c.bf16 %v1421_v50, %v1421_v50  ;;  %v2332_v50 = vld [vmem:[%s2822_s6] ss:$0 sm:$0xff] }
0x1315   :  { %1424 = vrot.lane.b32.xlu1 %v1422_v51, %s2337_s0 }
0x1381   :  { %v1313_v43 = vpop.permute.xlu0 %1312 }
0x1382   :  { %2117 = vmatmul.mubr.msk.bf16.vlgmr.msra.gmra.mrb[40].mxu0 %vm178_vm4, %v1313_v43 }
0x1383   :  { %2129 = vmatpush3.bf16.msra.mxu0 %v2477_v36  ;;  %2132 = vmatprep.mubr.msk.bf16.mxu0 %vm2334_vm1, %v2333_v0  ;;  %v2328_v36 = vld [vmem:[%s2818_s2 + $0x8] sm:$0xff]  }
0x1384   :  { %2130 = vmatprep.subr.bf16.mxu0 %v2333_v0 }
0x1387   :  { %2131 = vmatpush3.bf16.msra.mxu0 %v2484_v37  ;;  %v1425_v52 = vpop.permute.xlu1 %1424 }
0x1388   :  { %2142 = vmatprep.subr.bf16.mxu0 %v2333_v0 }
0x138a   :  { %2133 = vmatmul.mubr.msk.bf16.vlgmr.msra.gmra.mrb[44].mxu0 %vm238_vm3, %v1425_v52 }
0x138b   :  { %2143 = vmatpush3.bf16.msra.mxu0 %v2327_v53  ;;  %2146 = vmatprep.mubr.msk.bf16.mxu0 %vm2334_vm1, %v2333_v0 }
0x138c   :  { %2144 = vmatprep.subr.bf16.mxu0 %v2333_v0 }
0x138f   :  { %2145 = vmatpush3.bf16.msra.mxu0 %v2328_v36 }
0x1390   :  { %2158 = vmatprep.subr.bf16.mxu0 %v2333_v0 }
0x1392   :  { %2147 = vmatmul.mubr.msk.bf16.vlgmr.msra.gmra.mrb[48].mxu0 %vm238_vm3, %v1425_v52 }
0x1393   :  { %2160 = vmatprep.mubr.msk.bf16.mxu0 %vm2334_vm1, %v2333_v0 }
0x1455   :  { %v1351_v37 = vpop.f32.mrb[40].mxu0 }
0x1456   :  { %v2118_v54 = vpop.f32.mrb[41].mxu0 }
0x1457   :  { %v1354_v55 = vpop.f32.mrb[42].mxu0 }
0x1458   :  { %v2119_v56 = vpop.f32.mrb[43].mxu0 }
0x145d   :  { %v1463_v57 = vpop.f32.mrb[44].mxu0 }
0x145e   :  { %v1464_v16 = vadd.f32 %v1463_v57, %v1351_v37  ;;  %v2134_v58 = vpop.f32.mrb[45].mxu0 }
0x145f   :  { %v1466_v59 = vpop.f32.mrb[46].mxu0 }
0x1460   :  { %v1469_v60 = vadd.f32 %v2517_v47, %v1464_v16  ;;  %v2135_v61 = vpop.f32.mrb[47].mxu0  ;;  %v1684_v59 = vld [vmem:[%s2823_s7] sm:$0xf] }
0x1462   :  { %2295 = vtanh.f32 %v1469_v60  ;;  %v1885_v47 = vmul.f32 -1.442695, %v1469_v60  ;;  %v1699_v60 = vsel %vm182_vm0, %v1684_v59, 0 }
0x1463   :  { %2159 = vmatpush3.bf16.msra.mxu0 %v1699_v60 }
0x1465   :  { %v1575_v63 = vpop.f32.mrb[48].mxu0 }
0x1466   :  { %v1581_v1 = vadd.f32 %v1575_v63, %v159_v62  ;;  %v2148_v4 = vpop.f32.mrb[49].mxu0 }
0x1467   :  { %v1578_v3 = vpop.f32.mrb[50].mxu0  ;;  %v1891_v4 = vld [vmem:[%s2824_s8] ss:$0 sm:$0xff] }
0x1468   :  { %2297 = vtanh.f32 %v1581_v1  ;;  %v2149_v5 = vpop.f32.mrb[51].mxu0  ;;  %v1888_v10 = vmul.f32 -1.442695, %v1581_v1 }
0x1469   :  { %2299 = vpow2.f32 %v1885_v47 }
0x146a   :  { %2301 = vpow2.f32 %v1888_v10 }
0x146c   :  { %v2296_v6 = vpop.eup %2295 }
0x146d   :  { %1479 = vrot.lane.b32.xlu0 %v2296_v6, %s2338_s26 }
0x1472   :  { %v2298_v9 = vpop.eup %2297 }
0x1473   :  { %1591 = vrot.lane.b32.xlu1 %v2298_v9, %s2336_s15  ;;  %v2300_v7 = vpop.eup %2299 }
0x1474   :  { %v1473_v8 = vadd.f32 1.0, %v2300_v7  ;;  %v2302_v14 = vpop.eup %2301 }
0x1475   :  { %v1585_v44 = vadd.f32 1.0, %v2302_v14 }
0x1476   :  { %2303 = vrcp.f32 %v1473_v8 }
0x1477   :  { %2305 = vrcp.f32 %v1585_v44 }
0x1480   :  { %v2304_v2 = vpop.eup %2303 }
0x1481   :  { %v2306_v18 = vpop.eup %2305  ;;  %v1477_v17 = vmul.f32 %v2304_v2, %v2717_v34  ;;  %v2331_v34 = vld [vmem:[%s2821_s4 + $0x8] sm:$0xff]  }
0x1482   :  { %v1589_v24 = vmul.f32 %v2306_v18, %v2721_v39 }
0x14df   :  { %v1480_v11 = vpop.permute.xlu0 %1479 }
0x14e0   :  { %v1482_v15 = vmul.f32 %v2304_v2, %v1480_v11 }
0x14e2   :  { %1484 = vrot.lane.b32.xlu0 %v1482_v15, %s2339_s5  ;;  %v2189_v15 = vld [vmem:[%s2825_s9] sm:$0xff]  }
0x14e5   :  { %v1592_v20 = vpop.permute.xlu1 %1591 }
0x14e6   :  { %v1594_v21 = vmul.f32 %v2306_v18, %v1592_v20 }
0x14e8   :  { %1596 = vrot.lane.b32.xlu1 %v1594_v21, %s2336_s15 }
0x1554   :  { %v1485_v19 = vpop.permute.xlu0 %1484 }
0x1555   :  { %v1487_v23 = vadd.f32 %v1485_v19, %v1477_v17 }
0x1557   :  { %2307 = vtanh.f32 %v1487_v23 }
0x155a   :  { %v1597_v25 = vpop.permute.xlu1 %1596 }
0x155b   :  { %v1599_v26 = vadd.f32 %v1597_v25, %v1589_v24 }
0x155d   :  { %2309 = vtanh.f32 %v1599_v26 }
0x1561   :  { %v2308_v22 = vpop.eup %2307 }
0x1562   :  { %1490 = vrot.lane.b32.xlu0 %v2308_v22, %s2339_s5 }
0x1567   :  { %v2310_v13 = vpop.eup %2309 }
0x1568   :  { %1602 = vrot.lane.b32.xlu1 %v2310_v13, %s2336_s15 }
0x15d4   :  { %v1491_v42 = vpop.permute.xlu0 %1490 }
0x15d5   :  { %v1493_v27 = vmul.f32 %v2304_v2, %v1491_v42 }
0x15d7   :  { %v1494_v28 = vpack.c.bf16 %v1493_v27, %v1493_v27 }
0x15d9   :  { %1496 = vrot.lane.b32.xlu0 %v1494_v28, %s2340_s27 }
0x15da   :  { %v1603_v29 = vpop.permute.xlu1 %1602 }
0x15db   :  { %v1605_v30 = vmul.f32 %v2306_v18, %v1603_v29  ;;  %v2190_v18 = vld [vmem:[%s2825_s9 + $0x8] sm:$0xff]  }
0x15dd   :  { %v1606_v31 = vpack.c.bf16 %v1605_v30, %v1605_v30 }
0x15df   :  { %1608 = vrot.lane.b32.xlu1 %v1606_v31, %s2337_s0 }
0x164b   :  { %v1497_v32 = vpop.permute.xlu0 %1496 }
0x164c   :  { %2139 = vmatmul.mubr.msk.bf16.vlgmr.msra.gmra.mrb[44].mxu1 %vm178_vm4, %v1497_v32 }
0x164d   :  { %2151 = vmatpush3.bf16.msra.mxu1 %v2330_v33  ;;  %2154 = vmatprep.mubr.msk.bf16.mxu1 %vm2334_vm1, %v2333_v0 }
0x164e   :  { %2152 = vmatprep.subr.bf16.mxu1 %v2333_v0 }
0x1651   :  { %2153 = vmatpush3.bf16.msra.mxu1 %v2331_v34  ;;  %v1609_v35 = vpop.permute.xlu1 %1608 }
0x1652   :  { %2164 = vmatprep.subr.bf16.mxu1 %v2333_v0 }
0x1654   :  { %2155 = vmatmul.mubr.msk.bf16.vlgmr.msra.gmra.mrb[48].mxu1 %vm238_vm3, %v1609_v35 }
0x1655   :  { %2168 = vmatprep.mubr.msk.bf16.mxu1 %vm2334_vm1, %v2333_v0  ;;  %2165 = vmatpush3.bf16.msra.mxu1 %v2189_v15 }
0x1656   :  { %2166 = vmatprep.subr.bf16.mxu1 %v2333_v0  ;;  %v1894_v0 = vld [vmem:[%s2827_s10] ss:$0 sm:$0xff] }
0x1659   :  { %2167 = vmatpush3.bf16.msra.mxu1 %v2190_v18 }
0x171f   :  { %v1535_v38 = vpop.f32.mrb[44].mxu1 }
0x1720   :  { %v2140_v39 = vpop.f32.mrb[45].mxu1 }
0x1721   :  { %v1538_v45 = vpop.f32.mrb[46].mxu1 }
0x1722   :  { %v2141_v40 = vpop.f32.mrb[47].mxu1 }
0x1727   :  { %v1647_v41 = vpop.f32.mrb[48].mxu1 }
0x1728   :  { %v1648_v46 = vadd.f32 %v1647_v41, %v1535_v38  ;;  %v2156_v48 = vpop.f32.mrb[49].mxu1 }
0x1729   :  { %v1650_v49 = vpop.f32.mrb[50].mxu1 }
0x172a   :  { %v1653_v51 = vadd.f32 %v2332_v50, %v1648_v46  ;;  %v2157_v43 = vpop.f32.mrb[51].mxu1 }
0x172c   :  { %2311 = vtanh.f32 %v1653_v51  ;;  %v1890_v53 = vmul.f32 -1.442695, %v1653_v51 }
0x172e   :  { %2313 = vpow2.f32 %v1890_v53 }
0x1736   :  { %v2312_v52 = vpop.eup %2311 }
0x1737   :  { %1663 = vrot.lane.b32.xlu0 %v2312_v52, %s2338_s26 }
0x1738   :  { %v2314_v36 = vpop.eup %2313 }
0x1739   :  { %v1657_v37 = vadd.f32 1.0, %v2314_v36 }
0x173b   :  { %2315 = vrcp.f32 %v1657_v37 }
0x1745   :  { %v2316_v54 = vpop.eup %2315 }
0x1746   :  { %v1661_v57 = vmul.f32 %v2316_v54, %v1487_v23 }
0x17a9   :  { %v1664_v55 = vpop.permute.xlu0 %1663 }
0x17aa   :  { %v1666_v56 = vmul.f32 %v2316_v54, %v1664_v55 }
0x17ac   :  { %1668 = vrot.lane.b32.xlu1 %v1666_v56, %s2339_s5 }
0x181e   :  { %v1669_v16 = vpop.permute.xlu1 %1668 }
0x181f   :  { %v1671_v58 = vadd.f32 %v1669_v16, %v1661_v57 }
0x1821   :  { %2317 = vtanh.f32 %v1671_v58 }
0x182b   :  { %v2318_v61 = vpop.eup %2317 }
0x182c   :  { %1674 = vrot.lane.b32.xlu0 %v2318_v61, %s2339_s5 }
0x189e   :  { %v1675_v12 = vpop.permute.xlu0 %1674 }
0x189f   :  { %v1677_v62 = vmul.f32 %v2316_v54, %v1675_v12 }
0x18a1   :  { %v1683_v63 = vpack.c.bf16 %v1677_v62, %v1677_v62 }
0x18a3   :  { %1693 = vrot.lane.b32.xlu1 %v1683_v63, %s2340_s27 }
0x1915   :  { %v1694_v1 = vpop.permute.xlu1 %1693 }
0x1916   :  { %2161 = vmatmul.mubr.msk.bf16.vlgmr.msra.gmra.mrb[52].mxu0 %vm178_vm4, %v1694_v1 }
0x19e9   :  { %v1735_v3 = vpop.f32.mrb[52].mxu0 }
0x19ea   :  { %v1736_v5 = vadd.f32 %v1891_v4, %v1735_v3  ;;  %v2162_v6 = vpop.f32.mrb[53].mxu0 }
0x19eb   :  { %v1738_v9 = vpop.f32.mrb[54].mxu0 }
0x19ec   :  { %2319 = vtanh.f32 %v1736_v5  ;;  %v2163_v47 = vpop.f32.mrb[55].mxu0  ;;  %v1893_v7 = vmul.f32 -1.442695, %v1736_v5 }
0x19ee   :  { %2321 = vpow2.f32 %v1893_v7 }
0x19f6   :  { %v2320_v10 = vpop.eup %2319 }
0x19f7   :  { %1749 = vrot.lane.b32.xlu0 %v2320_v10, %s2336_s15 }
0x19f8   :  { %v2322_v8 = vpop.eup %2321 }
0x19f9   :  { %v1744_v14 = vadd.f32 1.0, %v2322_v8 }
0x19fb   :  { %2323 = vrcp.f32 %v1744_v14 }
0x1a05   :  { %v2324_v44 = vpop.eup %2323 }
0x1a69   :  { %v1750_v2 = vpop.permute.xlu0 %1749 }
0x1a6a   :  { %v1752_v11 = vmul.f32 %v2324_v44, %v1750_v2 }
0x1a6c   :  { %2325 = vtanh.f32 %v1752_v11 }
0x1a76   :  { %v2326_v20 = vpop.eup %2325 }
0x1a77   :  { %1755 = vrot.lane.b32.xlu1 %v2326_v20, %s2337_s0 }
0x1a7b   :  { %1679 = vrot.lane.b32.xlu1 %v1677_v62, %s2340_s27 }
0x1ae9   :  { %v1756_v21 = vpop.permute.xlu1 %1755 }
0x1aea   :  { %v1758_v17 = vmul.f32 %v2324_v44, %v1756_v21 }
0x1aec   :  { %v1759_v19 = vpack.c.bf16 %v1758_v17, %v1758_v17 }
0x1aed   :  { %v1680_v23 = vpop.permute.xlu1 %1679 }
0x1aee   :  { %1682 = vst.msk [vmem:[%s2826_s12] sm:$0xff] %vm178_vm4, %v1680_v23  ;;  %1772 = vrot.lane.b32.xlu0 %v1759_v19, %s2337_s0 }
0x1b60   :  { %v1773_v24 = vpop.permute.xlu0 %1772 }
0x1b61   :  { %2169 = vmatmul.mubr.msk.bf16.vlgmr.msra.gmra.mrb[52].mxu1 %vm238_vm3, %v1773_v24 }
0x1c34   :  { %v1823_v25 = vpop.f32.mrb[52].mxu1 }
0x1c35   :  { %v1824_v26 = vadd.f32 %v1894_v0, %v1823_v25  ;;  %v2170_v22 = vpop.f32.mrb[53].mxu1 }
0x1c36   :  { %v1826_v13 = vpop.f32.mrb[54].mxu1 }
0x1c37   :  { %1829 = vst.msk [vmem:[%s2828_s11] sm:$0xff] %vm84_vm2, %v1824_v26  ;;  %v2171_v42 = vpop.f32.mrb[55].mxu1 }

</bundles_post_ra>
